<compile_context>
chip_gen: v5e
topology: v5e:2x2
jax: 0.10.0
libtpu: 0.0.40
codegen_flags: <defaults>
</compile_context>

<pallas_src>
import functools

import jax
import jax.numpy as jnp
from jax.experimental import pallas as pl
from jax.experimental.pallas import tpu as pltpu

KERNEL_SIZE = 7
PAD = KERNEL_SIZE // 2
NTAPS = KERNEL_SIZE * KERNEL_SIZE


def _spatial_attention_kernel(wcol_ref, mask_ref, x_ref, o_ref, *,
                              width, hw, hwp, bt, factored):
    # wcol_ref: VMEM (2*bt, 49) f32 per-sublane conv taps; rows [0:bt] carry
    #           the (1/C-scaled) "avg" taps, rows [bt:2bt] the "max" taps.
    # mask_ref: VMEM (14, hwp) f32 {0,1}: rows 0..6 column (kw) masks, rows
    #           7..13 row (kh) masks — conv zero padding + roll wrap-around.
    # x_ref:    VMEM (bt, C, hw) input block (native dtype, lane-dense HW).
    # o_ref:    VMEM (bt, C, hw) output block.

    # Channel reductions in f32, stacked along sublanes:
    #   rows [0:bt] = per-batch-row channel sum, rows [bt:2bt] = channel max.
    sum_rows, max_rows = [], []
    for b in range(bt):
        xb = x_ref[b]                                             # (C, hw)
        sum_rows.append(jnp.sum(xb, axis=0, keepdims=True, dtype=jnp.float32))
        max_rows.append(jnp.max(xb, axis=0, keepdims=True).astype(jnp.float32))
    feats = jnp.concatenate(sum_rows + max_rows, axis=0)          # (2bt, hw)
    if hwp != hw:
        # Lane-pad only the small feature slab (zeros), never x itself.
        feats = jnp.zeros((2 * bt, hwp), jnp.float32).at[:, :hw].set(feats)

    # Hoist tap columns and mask rows out of the conv loops.
    wcols = [wcol_ref[:, pl.ds(t, 1)] for t in range(NTAPS)]      # each (2bt, 1)
    wmask = [mask_ref[pl.ds(kw, 1), :] for kw in range(KERNEL_SIZE)]              # (1, hwp)
    hmask = [mask_ref[pl.ds(KERNEL_SIZE + kh, 1), :] for kh in range(KERNEL_SIZE)]

    def col_shift(kw):
        # Position p sees feats[p + dw]; the mask reproduces the conv zero
        # padding at row edges AND kills roll wrap-around lanes.
        dw = kw - PAD
        if dw == 0:
            return feats                      # mask is all-ones inside the image
        r = pltpu.roll(feats, shift=(-dw) % hwp, axis=1)
        return wmask[kw] * r

    acc = jnp.zeros((2 * bt, hwp), jnp.float32)
    if factored:
        # 7 cached column shifts reused across all 7 row taps (13 rolls total).
        shifted = [col_shift(kw) for kw in range(KERNEL_SIZE)]
        for kh in range(KERNEL_SIZE):
            dh = kh - PAD
            row = shifted[0] * wcols[kh * KERNEL_SIZE]
            for kw in range(1, KERNEL_SIZE):
                row = row + shifted[kw] * wcols[kh * KERNEL_SIZE + kw]
            if dh != 0:
                row = hmask[kh] * pltpu.roll(row, shift=(-dh * width) % hwp, axis=1)
            acc = acc + row
    else:
        # Large H*W: recompute the lane roll per tap so only one shifted
        # temporary is live (XLU slack traded against vreg spill traffic).
        for kh in range(KERNEL_SIZE):
            dh = kh - PAD
            row = col_shift(0) * wcols[kh * KERNEL_SIZE]
            for kw in range(1, KERNEL_SIZE):
                row = row + col_shift(kw) * wcols[kh * KERNEL_SIZE + kw]
            if dh != 0:
                row = hmask[kh] * pltpu.roll(row, shift=(-dh * width) % hwp, axis=1)
            acc = acc + row

    conv = acc[:bt] + acc[bt:]                   # sum the two conv input channels -> (bt, hwp)

    # sigmoid: exp on the EUP, approx reciprocal + one Newton step (f32-accurate).
    u = 1.0 + jnp.exp(-conv)
    r = pl.reciprocal(u, approx=True)
    scale = r * (2.0 - u * r)                    # (bt, hwp) f32

    # Rescale in f32 (bf16 inputs are only cast, never bf16 arithmetic) and
    # cast once at the lane-dense store.
    for b in range(bt):
        sc = scale[b:b + 1, :hw]                                  # (1, hw)
        o_ref[b] = (x_ref[b].astype(jnp.float32) * sc).astype(o_ref.dtype)


def _pick_block_batch(B, C, HWp, itemsize, vmem_budget):
    """Largest divisor of B (<=4: 2*bt=8 sublanes is full density) that fits VMEM."""
    best = 1
    for bt in range(1, min(B, 4) + 1):
        if B % bt:
            continue
        x_block = bt * max(C, 8) * HWp * itemsize      # sublane/lane-padded VMEM tile
        conv_ws = 12 * 2 * bt * HWp * 4                # feats/shifts/acc/temps (f32)
        fixed = (16 + 8) * HWp * 4 * 2                 # masks + weights (padded, 2 bufs)
        if 4 * x_block + conv_ws + fixed + (2 << 20) <= vmem_budget:
            best = bt
    return best


def spatial_attention(x, conv_weight):
    """x: (B, C, H, W); conv_weight: (1, 2, 7, 7) — PyTorch Conv2d(2, 1, 7, bias=False)."""
    B, C, H, W = x.shape
    HW = H * W
    HWp = ((HW + 127) // 128) * 128

    # Per-generation VMEM budget with ~25% headroom (48 MiB v7x, 96 MiB v5e/v6e).
    phys = None
    try:
        phys = getattr(pltpu.get_tpu_info(), "vmem_capacity_bytes", None)
    except Exception:
        phys = None
    if not phys:
        phys = 64 << 20
    vmem_budget = int(phys) * 3 // 4

    bt = _pick_block_batch(B, C, HWp, x.dtype.itemsize, vmem_budget)
    # kw-factored schedule only while the 7 cached column shifts fit in vregs.
    factored = (9 * 2 * bt * HWp * 4) <= (128 << 10)

    # Free reshape only — no HBM pad / slice of the activation.
    x_flat = x.reshape(B, C, HW)

    # Per-sublane tap columns: rows [0:bt] = "avg" channel taps with 1/C folded
    # in (kernel computes a channel *sum*), rows [bt:2bt] = "max" channel taps.
    w2 = conv_weight.astype(jnp.float32).reshape(2, NTAPS)
    w2 = w2 * jnp.array([[1.0 / C], [1.0]], dtype=jnp.float32)
    wcol = jnp.repeat(w2, bt, axis=0)                              # (2*bt, 49)

    # {0,1} boundary masks in flat (h*W + w) coordinates: rows 0..6 = column
    # (kw) validity, rows 7..13 = row (kh) validity (also kills roll wrap).
    f_idx = jnp.arange(HWp, dtype=jnp.int32)
    w_pos = f_idx % W
    wmask = jnp.stack([(w_pos + (kw - PAD) >= 0) & (w_pos + (kw - PAD) < W)
                       for kw in range(KERNEL_SIZE)])
    hmask = jnp.stack([(f_idx + (kh - PAD) * W >= 0) & (f_idx + (kh - PAD) * W < HW)
                       for kh in range(KERNEL_SIZE)])
    masks = jnp.concatenate([wmask, hmask], axis=0).astype(jnp.float32)   # (14, HWp)

    kernel = functools.partial(_spatial_attention_kernel, width=W, hw=HW,
                               hwp=HWp, bt=bt, factored=factored)

    out = pl.pallas_call(
        kernel,
        out_shape=jax.ShapeDtypeStruct((B, C, HW), x.dtype),
        grid=(B // bt,),
        in_specs=[
            pl.BlockSpec((2 * bt, NTAPS), lambda b: (0, 0)),          # conv tap columns
            pl.BlockSpec((2 * KERNEL_SIZE, HWp), lambda b: (0, 0)),   # boundary masks
            pl.BlockSpec((bt, C, HW), lambda b: (b, 0, 0)),           # x block (full C, HW)
        ],
        out_specs=pl.BlockSpec((bt, C, HW), lambda b: (b, 0, 0)),
        compiler_params=pltpu.CompilerParams(
            dimension_semantics=("parallel",),
            vmem_limit_bytes=vmem_budget),
    )(wcol, masks, x_flat)

    return out.reshape(B, C, H, W)


def spatial_attention_reference(x, conv_weight):
    xf = x.astype(jnp.float32)
    avg = jnp.mean(xf, axis=1, keepdims=True)
    mx = jnp.max(xf, axis=1, keepdims=True)
    feat = jnp.concatenate([avg, mx], axis=1)
    conv = jax.lax.conv_general_dilated(
        feat, conv_weight.astype(jnp.float32), window_strides=(1, 1),
        padding=((PAD, PAD), (PAD, PAD)),
        dimension_numbers=("NCHW", "OIHW", "NCHW"))
    return (xf * jax.nn.sigmoid(conv)).astype(x.dtype)


if __name__ == "__main__":
    key = jax.random.PRNGKey(0)
    kx, kw_ = jax.random.split(key)
    conv_weight = 0.1 * jax.random.normal(
        kw_, (1, 2, KERNEL_SIZE, KERNEL_SIZE), dtype=jnp.float32)

    cases = [
        ((2, 4, 16, 16), jnp.float32, 1e-4),    # H*W is a multiple of 128
        ((2, 8, 12, 12), jnp.float32, 1e-4),    # non-128-multiple H*W (in-kernel lane pad)
        ((2, 4, 16, 16), jnp.bfloat16, 5e-2),   # bf16 activations (f32 math, cast at store)
    ]
    for shape, dtype, tol in cases:
        xin = jax.random.normal(kx, shape, dtype=jnp.float32).astype(dtype)
        out = spatial_attention(xin, conv_weight)
        jax.block_until_ready(out)
        ref = spatial_attention_reference(xin, conv_weight)
        assert out.shape == xin.shape and out.dtype == xin.dtype
        err = float(jnp.max(jnp.abs(out.astype(jnp.float32) - ref.astype(jnp.float32))))
        assert err < tol, f"mismatch vs reference for {shape} {dtype}: {err}"

    print("KERNEL_OK")
</pallas_src>

<mosaic_0001>
module attributes {stable_mosaic.version = 11 : i64} {
  func.func @_spatial_attention_kernel(%arg0: i32, %arg1: memref<4x49xf32, #tpu.memory_space<vmem>>, %arg2: memref<14x256xf32, #tpu.memory_space<vmem>>, %arg3: memref<2x4x256xf32, #tpu.memory_space<vmem>>, %arg4: memref<2x4x256xf32, #tpu.memory_space<vmem>>) attributes {dimension_semantics = [#tpu.dimension_semantics<parallel>], iteration_bounds = array<i64: 1>, scalar_prefetch = 0 : i64, scratch_operands = 0 : i64, tpu.core_type = #tpu.core_type<tc>, window_params = [{pipeline_mode = #tpu.pipeline_mode<synchronous>, transform_indices = @transform_0, window_bounds = array<i64: 4, 49>}, {pipeline_mode = #tpu.pipeline_mode<synchronous>, transform_indices = @transform_1, window_bounds = array<i64: 14, 256>}, {transform_indices = @transform_2, window_bounds = array<i64: 2, 4, 256>}, {transform_indices = @transform_3, window_bounds = array<i64: 2, 4, 256>}]} {
    %c0 = arith.constant 0 : index
    %c0_0 = arith.constant 0 : index
    %c0_1 = arith.constant 0 : index
    %0 = vector.load %arg3[%c0, %c0_0, %c0_1] : memref<2x4x256xf32, #tpu.memory_space<vmem>>, vector<1x4x256xf32>
    %1 = vector.shape_cast %0 : vector<1x4x256xf32> to vector<4x256xf32>
    %cst = arith.constant dense<0.000000e+00> : vector<256xf32>
    %2 = vector.multi_reduction <add>, %1, %cst [0] : vector<4x256xf32> to vector<256xf32>
    %3 = vector.shape_cast %2 : vector<256xf32> to vector<1x256xf32>
    %cst_2 = arith.constant dense<0xFF800000> : vector<256xf32>
    %4 = vector.multi_reduction <maximumf>, %1, %cst_2 [0] : vector<4x256xf32> to vector<256xf32>
    %5 = vector.shape_cast %4 : vector<256xf32> to vector<1x256xf32>
    %c1 = arith.constant 1 : index
    %c0_3 = arith.constant 0 : index
    %c0_4 = arith.constant 0 : index
    %6 = vector.load %arg3[%c1, %c0_3, %c0_4] : memref<2x4x256xf32, #tpu.memory_space<vmem>>, vector<1x4x256xf32>
    %7 = vector.shape_cast %6 : vector<1x4x256xf32> to vector<4x256xf32>
    %cst_5 = arith.constant dense<0.000000e+00> : vector<256xf32>
    %8 = vector.multi_reduction <add>, %7, %cst_5 [0] : vector<4x256xf32> to vector<256xf32>
    %9 = vector.shape_cast %8 : vector<256xf32> to vector<1x256xf32>
    %cst_6 = arith.constant dense<0xFF800000> : vector<256xf32>
    %10 = vector.multi_reduction <maximumf>, %7, %cst_6 [0] : vector<4x256xf32> to vector<256xf32>
    %11 = vector.shape_cast %10 : vector<256xf32> to vector<1x256xf32>
    %12 = tpu.concatenate %3, %9, %5, %11 in 0 : vector<1x256xf32>, vector<1x256xf32>, vector<1x256xf32>, vector<1x256xf32> -> vector<4x256xf32>
    %c0_7 = arith.constant 0 : index
    %c0_8 = arith.constant 0 : index
    %13 = vector.load %arg1[%c0_7, %c0_8] : memref<4x49xf32, #tpu.memory_space<vmem>>, vector<4x1xf32>
    %c0_9 = arith.constant 0 : index
    %c1_10 = arith.constant 1 : index
    %14 = vector.load %arg1[%c0_9, %c1_10] : memref<4x49xf32, #tpu.memory_space<vmem>>, vector<4x1xf32>
    %c0_11 = arith.constant 0 : index
    %c2 = arith.constant 2 : index
    %15 = vector.load %arg1[%c0_11, %c2] : memref<4x49xf32, #tpu.memory_space<vmem>>, vector<4x1xf32>
    %c0_12 = arith.constant 0 : index
    %c3 = arith.constant 3 : index
    %16 = vector.load %arg1[%c0_12, %c3] : memref<4x49xf32, #tpu.memory_space<vmem>>, vector<4x1xf32>
    %c0_13 = arith.constant 0 : index
    %c4 = arith.constant 4 : index
    %17 = vector.load %arg1[%c0_13, %c4] : memref<4x49xf32, #tpu.memory_space<vmem>>, vector<4x1xf32>
    %c0_14 = arith.constant 0 : index
    %c5 = arith.constant 5 : index
    %18 = vector.load %arg1[%c0_14, %c5] : memref<4x49xf32, #tpu.memory_space<vmem>>, vector<4x1xf32>
    %c0_15 = arith.constant 0 : index
    %c6 = arith.constant 6 : index
    %19 = vector.load %arg1[%c0_15, %c6] : memref<4x49xf32, #tpu.memory_space<vmem>>, vector<4x1xf32>
    %c0_16 = arith.constant 0 : index
    %c7 = arith.constant 7 : index
    %20 = vector.load %arg1[%c0_16, %c7] : memref<4x49xf32, #tpu.memory_space<vmem>>, vector<4x1xf32>
    %c0_17 = arith.constant 0 : index
    %c8 = arith.constant 8 : index
    %21 = vector.load %arg1[%c0_17, %c8] : memref<4x49xf32, #tpu.memory_space<vmem>>, vector<4x1xf32>
    %c0_18 = arith.constant 0 : index
    %c9 = arith.constant 9 : index
    %22 = vector.load %arg1[%c0_18, %c9] : memref<4x49xf32, #tpu.memory_space<vmem>>, vector<4x1xf32>
    %c0_19 = arith.constant 0 : index
    %c10 = arith.constant 10 : index
    %23 = vector.load %arg1[%c0_19, %c10] : memref<4x49xf32, #tpu.memory_space<vmem>>, vector<4x1xf32>
    %c0_20 = arith.constant 0 : index
    %c11 = arith.constant 11 : index
    %24 = vector.load %arg1[%c0_20, %c11] : memref<4x49xf32, #tpu.memory_space<vmem>>, vector<4x1xf32>
    %c0_21 = arith.constant 0 : index
    %c12 = arith.constant 12 : index
    %25 = vector.load %arg1[%c0_21, %c12] : memref<4x49xf32, #tpu.memory_space<vmem>>, vector<4x1xf32>
    %c0_22 = arith.constant 0 : index
    %c13 = arith.constant 13 : index
    %26 = vector.load %arg1[%c0_22, %c13] : memref<4x49xf32, #tpu.memory_space<vmem>>, vector<4x1xf32>
    %c0_23 = arith.constant 0 : index
    %c14 = arith.constant 14 : index
    %27 = vector.load %arg1[%c0_23, %c14] : memref<4x49xf32, #tpu.memory_space<vmem>>, vector<4x1xf32>
    %c0_24 = arith.constant 0 : index
    %c15 = arith.constant 15 : index
    %28 = vector.load %arg1[%c0_24, %c15] : memref<4x49xf32, #tpu.memory_space<vmem>>, vector<4x1xf32>
    %c0_25 = arith.constant 0 : index
    %c16 = arith.constant 16 : index
    %29 = vector.load %arg1[%c0_25, %c16] : memref<4x49xf32, #tpu.memory_space<vmem>>, vector<4x1xf32>
    %c0_26 = arith.constant 0 : index
    %c17 = arith.constant 17 : index
    %30 = vector.load %arg1[%c0_26, %c17] : memref<4x49xf32, #tpu.memory_space<vmem>>, vector<4x1xf32>
    %c0_27 = arith.constant 0 : index
    %c18 = arith.constant 18 : index
    %31 = vector.load %arg1[%c0_27, %c18] : memref<4x49xf32, #tpu.memory_space<vmem>>, vector<4x1xf32>
    %c0_28 = arith.constant 0 : index
    %c19 = arith.constant 19 : index
    %32 = vector.load %arg1[%c0_28, %c19] : memref<4x49xf32, #tpu.memory_space<vmem>>, vector<4x1xf32>
    %c0_29 = arith.constant 0 : index
    %c20 = arith.constant 20 : index
    %33 = vector.load %arg1[%c0_29, %c20] : memref<4x49xf32, #tpu.memory_space<vmem>>, vector<4x1xf32>
    %c0_30 = arith.constant 0 : index
    %c21 = arith.constant 21 : index
    %34 = vector.load %arg1[%c0_30, %c21] : memref<4x49xf32, #tpu.memory_space<vmem>>, vector<4x1xf32>
    %c0_31 = arith.constant 0 : index
    %c22 = arith.constant 22 : index
    %35 = vector.load %arg1[%c0_31, %c22] : memref<4x49xf32, #tpu.memory_space<vmem>>, vector<4x1xf32>
    %c0_32 = arith.constant 0 : index
    %c23 = arith.constant 23 : index
    %36 = vector.load %arg1[%c0_32, %c23] : memref<4x49xf32, #tpu.memory_space<vmem>>, vector<4x1xf32>
    %c0_33 = arith.constant 0 : index
    %c24 = arith.constant 24 : index
    %37 = vector.load %arg1[%c0_33, %c24] : memref<4x49xf32, #tpu.memory_space<vmem>>, vector<4x1xf32>
    %c0_34 = arith.constant 0 : index
    %c25 = arith.constant 25 : index
    %38 = vector.load %arg1[%c0_34, %c25] : memref<4x49xf32, #tpu.memory_space<vmem>>, vector<4x1xf32>
    %c0_35 = arith.constant 0 : index
    %c26 = arith.constant 26 : index
    %39 = vector.load %arg1[%c0_35, %c26] : memref<4x49xf32, #tpu.memory_space<vmem>>, vector<4x1xf32>
    %c0_36 = arith.constant 0 : index
    %c27 = arith.constant 27 : index
    %40 = vector.load %arg1[%c0_36, %c27] : memref<4x49xf32, #tpu.memory_space<vmem>>, vector<4x1xf32>
    %c0_37 = arith.constant 0 : index
    %c28 = arith.constant 28 : index
    %41 = vector.load %arg1[%c0_37, %c28] : memref<4x49xf32, #tpu.memory_space<vmem>>, vector<4x1xf32>
    %c0_38 = arith.constant 0 : index
    %c29 = arith.constant 29 : index
    %42 = vector.load %arg1[%c0_38, %c29] : memref<4x49xf32, #tpu.memory_space<vmem>>, vector<4x1xf32>
    %c0_39 = arith.constant 0 : index
    %c30 = arith.constant 30 : index
    %43 = vector.load %arg1[%c0_39, %c30] : memref<4x49xf32, #tpu.memory_space<vmem>>, vector<4x1xf32>
    %c0_40 = arith.constant 0 : index
    %c31 = arith.constant 31 : index
    %44 = vector.load %arg1[%c0_40, %c31] : memref<4x49xf32, #tpu.memory_space<vmem>>, vector<4x1xf32>
    %c0_41 = arith.constant 0 : index
    %c32 = arith.constant 32 : index
    %45 = vector.load %arg1[%c0_41, %c32] : memref<4x49xf32, #tpu.memory_space<vmem>>, vector<4x1xf32>
    %c0_42 = arith.constant 0 : index
    %c33 = arith.constant 33 : index
    %46 = vector.load %arg1[%c0_42, %c33] : memref<4x49xf32, #tpu.memory_space<vmem>>, vector<4x1xf32>
    %c0_43 = arith.constant 0 : index
    %c34 = arith.constant 34 : index
    %47 = vector.load %arg1[%c0_43, %c34] : memref<4x49xf32, #tpu.memory_space<vmem>>, vector<4x1xf32>
    %c0_44 = arith.constant 0 : index
    %c35 = arith.constant 35 : index
    %48 = vector.load %arg1[%c0_44, %c35] : memref<4x49xf32, #tpu.memory_space<vmem>>, vector<4x1xf32>
    %c0_45 = arith.constant 0 : index
    %c36 = arith.constant 36 : index
    %49 = vector.load %arg1[%c0_45, %c36] : memref<4x49xf32, #tpu.memory_space<vmem>>, vector<4x1xf32>
    %c0_46 = arith.constant 0 : index
    %c37 = arith.constant 37 : index
    %50 = vector.load %arg1[%c0_46, %c37] : memref<4x49xf32, #tpu.memory_space<vmem>>, vector<4x1xf32>
    %c0_47 = arith.constant 0 : index
    %c38 = arith.constant 38 : index
    %51 = vector.load %arg1[%c0_47, %c38] : memref<4x49xf32, #tpu.memory_space<vmem>>, vector<4x1xf32>
    %c0_48 = arith.constant 0 : index
    %c39 = arith.constant 39 : index
    %52 = vector.load %arg1[%c0_48, %c39] : memref<4x49xf32, #tpu.memory_space<vmem>>, vector<4x1xf32>
    %c0_49 = arith.constant 0 : index
    %c40 = arith.constant 40 : index
    %53 = vector.load %arg1[%c0_49, %c40] : memref<4x49xf32, #tpu.memory_space<vmem>>, vector<4x1xf32>
    %c0_50 = arith.constant 0 : index
    %c41 = arith.constant 41 : index
    %54 = vector.load %arg1[%c0_50, %c41] : memref<4x49xf32, #tpu.memory_space<vmem>>, vector<4x1xf32>
    %c0_51 = arith.constant 0 : index
    %c42 = arith.constant 42 : index
    %55 = vector.load %arg1[%c0_51, %c42] : memref<4x49xf32, #tpu.memory_space<vmem>>, vector<4x1xf32>
    %c0_52 = arith.constant 0 : index
    %c43 = arith.constant 43 : index
    %56 = vector.load %arg1[%c0_52, %c43] : memref<4x49xf32, #tpu.memory_space<vmem>>, vector<4x1xf32>
    %c0_53 = arith.constant 0 : index
    %c44 = arith.constant 44 : index
    %57 = vector.load %arg1[%c0_53, %c44] : memref<4x49xf32, #tpu.memory_space<vmem>>, vector<4x1xf32>
    %c0_54 = arith.constant 0 : index
    %c45 = arith.constant 45 : index
    %58 = vector.load %arg1[%c0_54, %c45] : memref<4x49xf32, #tpu.memory_space<vmem>>, vector<4x1xf32>
    %c0_55 = arith.constant 0 : index
    %c46 = arith.constant 46 : index
    %59 = vector.load %arg1[%c0_55, %c46] : memref<4x49xf32, #tpu.memory_space<vmem>>, vector<4x1xf32>
    %c0_56 = arith.constant 0 : index
    %c47 = arith.constant 47 : index
    %60 = vector.load %arg1[%c0_56, %c47] : memref<4x49xf32, #tpu.memory_space<vmem>>, vector<4x1xf32>
    %c0_57 = arith.constant 0 : index
    %c48 = arith.constant 48 : index
    %61 = vector.load %arg1[%c0_57, %c48] : memref<4x49xf32, #tpu.memory_space<vmem>>, vector<4x1xf32>
    %c0_58 = arith.constant 0 : index
    %c0_59 = arith.constant 0 : index
    %62 = vector.load %arg2[%c0_58, %c0_59] : memref<14x256xf32, #tpu.memory_space<vmem>>, vector<1x256xf32>
    %c1_60 = arith.constant 1 : index
    %c0_61 = arith.constant 0 : index
    %63 = vector.load %arg2[%c1_60, %c0_61] : memref<14x256xf32, #tpu.memory_space<vmem>>, vector<1x256xf32>
    %c2_62 = arith.constant 2 : index
    %c0_63 = arith.constant 0 : index
    %64 = vector.load %arg2[%c2_62, %c0_63] : memref<14x256xf32, #tpu.memory_space<vmem>>, vector<1x256xf32>
    %c4_64 = arith.constant 4 : index
    %c0_65 = arith.constant 0 : index
    %65 = vector.load %arg2[%c4_64, %c0_65] : memref<14x256xf32, #tpu.memory_space<vmem>>, vector<1x256xf32>
    %c5_66 = arith.constant 5 : index
    %c0_67 = arith.constant 0 : index
    %66 = vector.load %arg2[%c5_66, %c0_67] : memref<14x256xf32, #tpu.memory_space<vmem>>, vector<1x256xf32>
    %c6_68 = arith.constant 6 : index
    %c0_69 = arith.constant 0 : index
    %67 = vector.load %arg2[%c6_68, %c0_69] : memref<14x256xf32, #tpu.memory_space<vmem>>, vector<1x256xf32>
    %c7_70 = arith.constant 7 : index
    %c0_71 = arith.constant 0 : index
    %68 = vector.load %arg2[%c7_70, %c0_71] : memref<14x256xf32, #tpu.memory_space<vmem>>, vector<1x256xf32>
    %c8_72 = arith.constant 8 : index
    %c0_73 = arith.constant 0 : index
    %69 = vector.load %arg2[%c8_72, %c0_73] : memref<14x256xf32, #tpu.memory_space<vmem>>, vector<1x256xf32>
    %c9_74 = arith.constant 9 : index
    %c0_75 = arith.constant 0 : index
    %70 = vector.load %arg2[%c9_74, %c0_75] : memref<14x256xf32, #tpu.memory_space<vmem>>, vector<1x256xf32>
    %c11_76 = arith.constant 11 : index
    %c0_77 = arith.constant 0 : index
    %71 = vector.load %arg2[%c11_76, %c0_77] : memref<14x256xf32, #tpu.memory_space<vmem>>, vector<1x256xf32>
    %c12_78 = arith.constant 12 : index
    %c0_79 = arith.constant 0 : index
    %72 = vector.load %arg2[%c12_78, %c0_79] : memref<14x256xf32, #tpu.memory_space<vmem>>, vector<1x256xf32>
    %c13_80 = arith.constant 13 : index
    %c0_81 = arith.constant 0 : index
    %73 = vector.load %arg2[%c13_80, %c0_81] : memref<14x256xf32, #tpu.memory_space<vmem>>, vector<1x256xf32>
    %cst_82 = arith.constant 0.000000e+00 : f32
    %74 = vector.broadcast %cst_82 : f32 to vector<4x256xf32>
    %c3_i32 = arith.constant 3 : i32
    %75 = tpu.dynamic_rotate %12 by %c3_i32 dim 1 : vector<4x256xf32>, i32 -> vector<4x256xf32>
    %76 = vector.broadcast %62 : vector<1x256xf32> to vector<4x256xf32>
    %77 = arith.mulf %76, %75 : vector<4x256xf32>
    %c2_i32 = arith.constant 2 : i32
    %78 = tpu.dynamic_rotate %12 by %c2_i32 dim 1 : vector<4x256xf32>, i32 -> vector<4x256xf32>
    %79 = vector.broadcast %63 : vector<1x256xf32> to vector<4x256xf32>
    %80 = arith.mulf %79, %78 : vector<4x256xf32>
    %c1_i32 = arith.constant 1 : i32
    %81 = tpu.dynamic_rotate %12 by %c1_i32 dim 1 : vector<4x256xf32>, i32 -> vector<4x256xf32>
    %82 = vector.broadcast %64 : vector<1x256xf32> to vector<4x256xf32>
    %83 = arith.mulf %82, %81 : vector<4x256xf32>
    %c255_i32 = arith.constant 255 : i32
    %84 = tpu.dynamic_rotate %12 by %c255_i32 dim 1 : vector<4x256xf32>, i32 -> vector<4x256xf32>
    %85 = vector.broadcast %65 : vector<1x256xf32> to vector<4x256xf32>
    %86 = arith.mulf %85, %84 : vector<4x256xf32>
    %c254_i32 = arith.constant 254 : i32
    %87 = tpu.dynamic_rotate %12 by %c254_i32 dim 1 : vector<4x256xf32>, i32 -> vector<4x256xf32>
    %88 = vector.broadcast %66 : vector<1x256xf32> to vector<4x256xf32>
    %89 = arith.mulf %88, %87 : vector<4x256xf32>
    %c253_i32 = arith.constant 253 : i32
    %90 = tpu.dynamic_rotate %12 by %c253_i32 dim 1 : vector<4x256xf32>, i32 -> vector<4x256xf32>
    %91 = vector.broadcast %67 : vector<1x256xf32> to vector<4x256xf32>
    %92 = arith.mulf %91, %90 : vector<4x256xf32>
    %93 = vector.broadcast %13 : vector<4x1xf32> to vector<4x256xf32>
    %94 = arith.mulf %77, %93 : vector<4x256xf32>
    %95 = vector.broadcast %14 : vector<4x1xf32> to vector<4x256xf32>
    %96 = arith.mulf %80, %95 : vector<4x256xf32>
    %97 = arith.addf %94, %96 : vector<4x256xf32>
    %98 = vector.broadcast %15 : vector<4x1xf32> to vector<4x256xf32>
    %99 = arith.mulf %83, %98 : vector<4x256xf32>
    %100 = arith.addf %97, %99 : vector<4x256xf32>
    %101 = vector.broadcast %16 : vector<4x1xf32> to vector<4x256xf32>
    %102 = arith.mulf %12, %101 : vector<4x256xf32>
    %103 = arith.addf %100, %102 : vector<4x256xf32>
    %104 = vector.broadcast %17 : vector<4x1xf32> to vector<4x256xf32>
    %105 = arith.mulf %86, %104 : vector<4x256xf32>
    %106 = arith.addf %103, %105 : vector<4x256xf32>
    %107 = vector.broadcast %18 : vector<4x1xf32> to vector<4x256xf32>
    %108 = arith.mulf %89, %107 : vector<4x256xf32>
    %109 = arith.addf %106, %108 : vector<4x256xf32>
    %110 = vector.broadcast %19 : vector<4x1xf32> to vector<4x256xf32>
    %111 = arith.mulf %92, %110 : vector<4x256xf32>
    %112 = arith.addf %109, %111 : vector<4x256xf32>
    %c48_i32 = arith.constant 48 : i32
    %113 = tpu.dynamic_rotate %112 by %c48_i32 dim 1 : vector<4x256xf32>, i32 -> vector<4x256xf32>
    %114 = vector.broadcast %68 : vector<1x256xf32> to vector<4x256xf32>
    %115 = arith.mulf %114, %113 : vector<4x256xf32>
    %116 = arith.addf %74, %115 : vector<4x256xf32>
    %117 = vector.broadcast %20 : vector<4x1xf32> to vector<4x256xf32>
    %118 = arith.mulf %77, %117 : vector<4x256xf32>
    %119 = vector.broadcast %21 : vector<4x1xf32> to vector<4x256xf32>
    %120 = arith.mulf %80, %119 : vector<4x256xf32>
    %121 = arith.addf %118, %120 : vector<4x256xf32>
    %122 = vector.broadcast %22 : vector<4x1xf32> to vector<4x256xf32>
    %123 = arith.mulf %83, %122 : vector<4x256xf32>
    %124 = arith.addf %121, %123 : vector<4x256xf32>
    %125 = vector.broadcast %23 : vector<4x1xf32> to vector<4x256xf32>
    %126 = arith.mulf %12, %125 : vector<4x256xf32>
    %127 = arith.addf %124, %126 : vector<4x256xf32>
    %128 = vector.broadcast %24 : vector<4x1xf32> to vector<4x256xf32>
    %129 = arith.mulf %86, %128 : vector<4x256xf32>
    %130 = arith.addf %127, %129 : vector<4x256xf32>
    %131 = vector.broadcast %25 : vector<4x1xf32> to vector<4x256xf32>
    %132 = arith.mulf %89, %131 : vector<4x256xf32>
    %133 = arith.addf %130, %132 : vector<4x256xf32>
    %134 = vector.broadcast %26 : vector<4x1xf32> to vector<4x256xf32>
    %135 = arith.mulf %92, %134 : vector<4x256xf32>
    %136 = arith.addf %133, %135 : vector<4x256xf32>
    %c32_i32 = arith.constant 32 : i32
    %137 = tpu.dynamic_rotate %136 by %c32_i32 dim 1 : vector<4x256xf32>, i32 -> vector<4x256xf32>
    %138 = vector.broadcast %69 : vector<1x256xf32> to vector<4x256xf32>
    %139 = arith.mulf %138, %137 : vector<4x256xf32>
    %140 = arith.addf %116, %139 : vector<4x256xf32>
    %141 = vector.broadcast %27 : vector<4x1xf32> to vector<4x256xf32>
    %142 = arith.mulf %77, %141 : vector<4x256xf32>
    %143 = vector.broadcast %28 : vector<4x1xf32> to vector<4x256xf32>
    %144 = arith.mulf %80, %143 : vector<4x256xf32>
    %145 = arith.addf %142, %144 : vector<4x256xf32>
    %146 = vector.broadcast %29 : vector<4x1xf32> to vector<4x256xf32>
    %147 = arith.mulf %83, %146 : vector<4x256xf32>
    %148 = arith.addf %145, %147 : vector<4x256xf32>
    %149 = vector.broadcast %30 : vector<4x1xf32> to vector<4x256xf32>
    %150 = arith.mulf %12, %149 : vector<4x256xf32>
    %151 = arith.addf %148, %150 : vector<4x256xf32>
    %152 = vector.broadcast %31 : vector<4x1xf32> to vector<4x256xf32>
    %153 = arith.mulf %86, %152 : vector<4x256xf32>
    %154 = arith.addf %151, %153 : vector<4x256xf32>
    %155 = vector.broadcast %32 : vector<4x1xf32> to vector<4x256xf32>
    %156 = arith.mulf %89, %155 : vector<4x256xf32>
    %157 = arith.addf %154, %156 : vector<4x256xf32>
    %158 = vector.broadcast %33 : vector<4x1xf32> to vector<4x256xf32>
    %159 = arith.mulf %92, %158 : vector<4x256xf32>
    %160 = arith.addf %157, %159 : vector<4x256xf32>
    %c16_i32 = arith.constant 16 : i32
    %161 = tpu.dynamic_rotate %160 by %c16_i32 dim 1 : vector<4x256xf32>, i32 -> vector<4x256xf32>
    %162 = vector.broadcast %70 : vector<1x256xf32> to vector<4x256xf32>
    %163 = arith.mulf %162, %161 : vector<4x256xf32>
    %164 = arith.addf %140, %163 : vector<4x256xf32>
    %165 = vector.broadcast %34 : vector<4x1xf32> to vector<4x256xf32>
    %166 = arith.mulf %77, %165 : vector<4x256xf32>
    %167 = vector.broadcast %35 : vector<4x1xf32> to vector<4x256xf32>
    %168 = arith.mulf %80, %167 : vector<4x256xf32>
    %169 = arith.addf %166, %168 : vector<4x256xf32>
    %170 = vector.broadcast %36 : vector<4x1xf32> to vector<4x256xf32>
    %171 = arith.mulf %83, %170 : vector<4x256xf32>
    %172 = arith.addf %169, %171 : vector<4x256xf32>
    %173 = vector.broadcast %37 : vector<4x1xf32> to vector<4x256xf32>
    %174 = arith.mulf %12, %173 : vector<4x256xf32>
    %175 = arith.addf %172, %174 : vector<4x256xf32>
    %176 = vector.broadcast %38 : vector<4x1xf32> to vector<4x256xf32>
    %177 = arith.mulf %86, %176 : vector<4x256xf32>
    %178 = arith.addf %175, %177 : vector<4x256xf32>
    %179 = vector.broadcast %39 : vector<4x1xf32> to vector<4x256xf32>
    %180 = arith.mulf %89, %179 : vector<4x256xf32>
    %181 = arith.addf %178, %180 : vector<4x256xf32>
    %182 = vector.broadcast %40 : vector<4x1xf32> to vector<4x256xf32>
    %183 = arith.mulf %92, %182 : vector<4x256xf32>
    %184 = arith.addf %181, %183 : vector<4x256xf32>
    %185 = arith.addf %164, %184 : vector<4x256xf32>
    %186 = vector.broadcast %41 : vector<4x1xf32> to vector<4x256xf32>
    %187 = arith.mulf %77, %186 : vector<4x256xf32>
    %188 = vector.broadcast %42 : vector<4x1xf32> to vector<4x256xf32>
    %189 = arith.mulf %80, %188 : vector<4x256xf32>
    %190 = arith.addf %187, %189 : vector<4x256xf32>
    %191 = vector.broadcast %43 : vector<4x1xf32> to vector<4x256xf32>
    %192 = arith.mulf %83, %191 : vector<4x256xf32>
    %193 = arith.addf %190, %192 : vector<4x256xf32>
    %194 = vector.broadcast %44 : vector<4x1xf32> to vector<4x256xf32>
    %195 = arith.mulf %12, %194 : vector<4x256xf32>
    %196 = arith.addf %193, %195 : vector<4x256xf32>
    %197 = vector.broadcast %45 : vector<4x1xf32> to vector<4x256xf32>
    %198 = arith.mulf %86, %197 : vector<4x256xf32>
    %199 = arith.addf %196, %198 : vector<4x256xf32>
    %200 = vector.broadcast %46 : vector<4x1xf32> to vector<4x256xf32>
    %201 = arith.mulf %89, %200 : vector<4x256xf32>
    %202 = arith.addf %199, %201 : vector<4x256xf32>
    %203 = vector.broadcast %47 : vector<4x1xf32> to vector<4x256xf32>
    %204 = arith.mulf %92, %203 : vector<4x256xf32>
    %205 = arith.addf %202, %204 : vector<4x256xf32>
    %c240_i32 = arith.constant 240 : i32
    %206 = tpu.dynamic_rotate %205 by %c240_i32 dim 1 : vector<4x256xf32>, i32 -> vector<4x256xf32>
    %207 = vector.broadcast %71 : vector<1x256xf32> to vector<4x256xf32>
    %208 = arith.mulf %207, %206 : vector<4x256xf32>
    %209 = arith.addf %185, %208 : vector<4x256xf32>
    %210 = vector.broadcast %48 : vector<4x1xf32> to vector<4x256xf32>
    %211 = arith.mulf %77, %210 : vector<4x256xf32>
    %212 = vector.broadcast %49 : vector<4x1xf32> to vector<4x256xf32>
    %213 = arith.mulf %80, %212 : vector<4x256xf32>
    %214 = arith.addf %211, %213 : vector<4x256xf32>
    %215 = vector.broadcast %50 : vector<4x1xf32> to vector<4x256xf32>
    %216 = arith.mulf %83, %215 : vector<4x256xf32>
    %217 = arith.addf %214, %216 : vector<4x256xf32>
    %218 = vector.broadcast %51 : vector<4x1xf32> to vector<4x256xf32>
    %219 = arith.mulf %12, %218 : vector<4x256xf32>
    %220 = arith.addf %217, %219 : vector<4x256xf32>
    %221 = vector.broadcast %52 : vector<4x1xf32> to vector<4x256xf32>
    %222 = arith.mulf %86, %221 : vector<4x256xf32>
    %223 = arith.addf %220, %222 : vector<4x256xf32>
    %224 = vector.broadcast %53 : vector<4x1xf32> to vector<4x256xf32>
    %225 = arith.mulf %89, %224 : vector<4x256xf32>
    %226 = arith.addf %223, %225 : vector<4x256xf32>
    %227 = vector.broadcast %54 : vector<4x1xf32> to vector<4x256xf32>
    %228 = arith.mulf %92, %227 : vector<4x256xf32>
    %229 = arith.addf %226, %228 : vector<4x256xf32>
    %c224_i32 = arith.constant 224 : i32
    %230 = tpu.dynamic_rotate %229 by %c224_i32 dim 1 : vector<4x256xf32>, i32 -> vector<4x256xf32>
    %231 = vector.broadcast %72 : vector<1x256xf32> to vector<4x256xf32>
    %232 = arith.mulf %231, %230 : vector<4x256xf32>
    %233 = arith.addf %209, %232 : vector<4x256xf32>
    %234 = vector.broadcast %55 : vector<4x1xf32> to vector<4x256xf32>
    %235 = arith.mulf %77, %234 : vector<4x256xf32>
    %236 = vector.broadcast %56 : vector<4x1xf32> to vector<4x256xf32>
    %237 = arith.mulf %80, %236 : vector<4x256xf32>
    %238 = arith.addf %235, %237 : vector<4x256xf32>
    %239 = vector.broadcast %57 : vector<4x1xf32> to vector<4x256xf32>
    %240 = arith.mulf %83, %239 : vector<4x256xf32>
    %241 = arith.addf %238, %240 : vector<4x256xf32>
    %242 = vector.broadcast %58 : vector<4x1xf32> to vector<4x256xf32>
    %243 = arith.mulf %12, %242 : vector<4x256xf32>
    %244 = arith.addf %241, %243 : vector<4x256xf32>
    %245 = vector.broadcast %59 : vector<4x1xf32> to vector<4x256xf32>
    %246 = arith.mulf %86, %245 : vector<4x256xf32>
    %247 = arith.addf %244, %246 : vector<4x256xf32>
    %248 = vector.broadcast %60 : vector<4x1xf32> to vector<4x256xf32>
    %249 = arith.mulf %89, %248 : vector<4x256xf32>
    %250 = arith.addf %247, %249 : vector<4x256xf32>
    %251 = vector.broadcast %61 : vector<4x1xf32> to vector<4x256xf32>
    %252 = arith.mulf %92, %251 : vector<4x256xf32>
    %253 = arith.addf %250, %252 : vector<4x256xf32>
    %c208_i32 = arith.constant 208 : i32
    %254 = tpu.dynamic_rotate %253 by %c208_i32 dim 1 : vector<4x256xf32>, i32 -> vector<4x256xf32>
    %255 = vector.broadcast %73 : vector<1x256xf32> to vector<4x256xf32>
    %256 = arith.mulf %255, %254 : vector<4x256xf32>
    %257 = arith.addf %233, %256 : vector<4x256xf32>
    %258 = vector.extract_strided_slice %257 {offsets = [0, 0], sizes = [2, 256], strides = [1, 1]} : vector<4x256xf32> to vector<2x256xf32>
    %259 = vector.extract_strided_slice %257 {offsets = [2, 0], sizes = [2, 256], strides = [1, 1]} : vector<4x256xf32> to vector<2x256xf32>
    %260 = arith.addf %258, %259 : vector<2x256xf32>
    %cst_83 = arith.constant 0.000000e+00 : f32
    %261 = vector.broadcast %cst_83 : f32 to vector<2x256xf32>
    %262 = arith.subf %261, %260 : vector<2x256xf32>
    %263 = math.exp %262 : vector<2x256xf32>
    %cst_84 = arith.constant 1.000000e+00 : f32
    %264 = vector.broadcast %cst_84 : f32 to vector<2x256xf32>
    %265 = arith.addf %264, %263 : vector<2x256xf32>
    %266 = tpu.reciprocal %265 {approx = true} : vector<2x256xf32> -> vector<2x256xf32>
    %267 = arith.mulf %265, %266 : vector<2x256xf32>
    %cst_85 = arith.constant 2.000000e+00 : f32
    %268 = vector.broadcast %cst_85 : f32 to vector<2x256xf32>
    %269 = arith.subf %268, %267 : vector<2x256xf32>
    %270 = arith.mulf %266, %269 : vector<2x256xf32>
    %271 = vector.extract_strided_slice %270 {offsets = [0, 0], sizes = [1, 256], strides = [1, 1]} : vector<2x256xf32> to vector<1x256xf32>
    %c0_86 = arith.constant 0 : index
    %c0_87 = arith.constant 0 : index
    %c0_88 = arith.constant 0 : index
    %272 = vector.load %arg3[%c0_86, %c0_87, %c0_88] : memref<2x4x256xf32, #tpu.memory_space<vmem>>, vector<1x4x256xf32>
    %273 = vector.shape_cast %272 : vector<1x4x256xf32> to vector<4x256xf32>
    %274 = vector.broadcast %271 : vector<1x256xf32> to vector<4x256xf32>
    %275 = arith.mulf %273, %274 : vector<4x256xf32>
    %c0_89 = arith.constant 0 : index
    %c0_90 = arith.constant 0 : index
    %c0_91 = arith.constant 0 : index
    %276 = vector.load %arg4[%c0_89, %c0_90, %c0_91] : memref<2x4x256xf32, #tpu.memory_space<vmem>>, vector<1x4x256xf32>
    %277 = vector.shape_cast %276 : vector<1x4x256xf32> to vector<4x256xf32>
    %278 = vector.shape_cast %275 : vector<4x256xf32> to vector<1x4x256xf32>
    tpu.vector_store %arg4[%c0_89, %c0_90, %c0_91], %278 {strides = array<i32>} : memref<2x4x256xf32, #tpu.memory_space<vmem>>, vector<1x4x256xf32>,
    %279 = vector.extract_strided_slice %270 {offsets = [1, 0], sizes = [1, 256], strides = [1, 1]} : vector<2x256xf32> to vector<1x256xf32>
    %c1_92 = arith.constant 1 : index
    %c0_93 = arith.constant 0 : index
    %c0_94 = arith.constant 0 : index
    %280 = vector.load %arg3[%c1_92, %c0_93, %c0_94] : memref<2x4x256xf32, #tpu.memory_space<vmem>>, vector<1x4x256xf32>
    %281 = vector.shape_cast %280 : vector<1x4x256xf32> to vector<4x256xf32>
    %282 = vector.broadcast %279 : vector<1x256xf32> to vector<4x256xf32>
    %283 = arith.mulf %281, %282 : vector<4x256xf32>
    %c1_95 = arith.constant 1 : index
    %c0_96 = arith.constant 0 : index
    %c0_97 = arith.constant 0 : index
    %284 = vector.load %arg4[%c1_95, %c0_96, %c0_97] : memref<2x4x256xf32, #tpu.memory_space<vmem>>, vector<1x4x256xf32>
    %285 = vector.shape_cast %284 : vector<1x4x256xf32> to vector<4x256xf32>
    %286 = vector.shape_cast %283 : vector<4x256xf32> to vector<1x4x256xf32>
    tpu.vector_store %arg4[%c1_95, %c0_96, %c0_97], %286 {strides = array<i32>} : memref<2x4x256xf32, #tpu.memory_space<vmem>>, vector<1x4x256xf32>,
    return
  }
  func.func @transform_0(%arg0: i32) -> (i32, i32) {
    %c0_i32 = arith.constant 0 : i32
    %c0_i32_0 = arith.constant 0 : i32
    %c0_i32_1 = arith.constant 0 : i32
    return %c0_i32, %c0_i32_0 : i32, i32
  }
  func.func @transform_1(%arg0: i32) -> (i32, i32) {
    %c0_i32 = arith.constant 0 : i32
    %c0_i32_0 = arith.constant 0 : i32
    %c0_i32_1 = arith.constant 0 : i32
    return %c0_i32, %c0_i32_0 : i32, i32
  }
  func.func @transform_2(%arg0: i32) -> (i32, i32, i32) {
    %c0_i32 = arith.constant 0 : i32
    %c0_i32_0 = arith.constant 0 : i32
    %c0_i32_1 = arith.constant 0 : i32
    return %arg0, %c0_i32, %c0_i32_0 : i32, i32, i32
  }
  func.func @transform_3(%arg0: i32) -> (i32, i32, i32) {
    %c0_i32 = arith.constant 0 : i32
    %c0_i32_0 = arith.constant 0 : i32
    %c0_i32_1 = arith.constant 0 : i32
    return %arg0, %c0_i32, %c0_i32_0 : i32, i32, i32
  }
}

</mosaic_0001>

<bundles_post_ra>
// kernel: tpu_custom_call.1
= control target key start
LH: loop header
LB: loop body
LE: loop exit
PB: predicated region body
PF: predicated region fallthrough
CT: control target
= control target key end

     0   :  { %8 = vsyncpa [#allocation3], 0  ;;  %s1470_s0 = inlined_call_operand.hbm [shape: f32[4,49], index: 0, kind: input, shape index: {}]   ;;  %s1471_s1 = inlined_call_operand.hbm [shape: f32[14,256], index: 1, kind: input, shape index: {}]   ;;  %s1472_s2 = inlined_call_operand.hbm [shape: f32[2,4,256], index: 2, kind: input, shape index: {}]   ;;  %s1473_s3 = inlined_call_operand.hbm [shape: f32[2,4,256], index: 3, kind: output, shape index: {}]  }
   0x1   :  { %9 = vsyncpa [#allocation6], 0  ;;  %s26_s14 = sshll.u32 %s1471_s1, 4  ;;  %s27_s14 = int_to_ptr.hbm [resolvable:$true] %s26_s14 }
   0x2   :  { %10 = vsyncpa [#allocation4], 0  ;;  %s1030_s15 = smov [#allocation5]   ;;  %s16_s19 = sshll.u32 %s1470_s0, 4  ;;  %s17_s19 = int_to_ptr.hbm [resolvable:$true] %s16_s19 }
   0x3   :  { %s28_s16 = sshll.u32 %s1030_s15, 4  ;;  %s1031_s20 = smov 256   ;;  %s29_s16 = int_to_ptr.vmem [resolvable:$true] %s28_s16 }
   0x4   :  { %s1032_s21 = smov 16   ;;  %s1033_s22 = smov [#allocation2]  }
   0x5   :  { %34 = dma.hbm_to_vmem [thread:$0]  %s27_s14, 512, %s29_s16, [#allocation6], %s1031_s20, %s1031_s20, %s1032_s21  }
   0x6   :  { %s18_s23 = sshll.u32 %s1033_s22, 4  ;;  %s39_s1 = sshll.u32 %s1472_s2, 4  ;;  %s19_s23 = int_to_ptr.vmem [resolvable:$true] %s18_s23  ;;  %s40_s1 = int_to_ptr.hbm [resolvable:$true] %s39_s1 }
   0x7   :  { %21 = dma.hbm_to_vmem [thread:$0]  %s17_s19, 64, %s19_s23, [#allocation3]  }
   0x8   :  { %s1034_s26 = smov [#allocation7]   ;;  %s1035_s28 = smov 128  }
   0x9   :  { %s41_s27 = sshll.u32 %s1034_s26, 4  ;;  %s1036_s29 = smov 8   ;;  %s42_s27 = int_to_ptr.vmem [resolvable:$true] %s41_s27 }
   0xa   :  { %47 = dma.hbm_to_vmem [thread:$0]  %s40_s1, 256, %s42_s27, [#allocation6], %s1035_s28, %s1035_s28, %s1036_s29  }
   0xb   :  { %1024 = dma.done.wait [#allocation3], 64  }
   0xc   :  { %1025 = vsyncadd [#allocation3], 4294967232 }
   0xd   :  { %1026 = dma.done.wait [#allocation6], 768  }
   0xe   :  { %1027 = vsyncadd [#allocation6], 4294966528  ;;  %v1037_v0 = vmov 2   ;;  %v1038_v1 = vmov 1   ;;  %v1039_v2 = vmov 0   ;;  %v1133_v4 = vld [vmem:[#allocation7] sm:$0xff] }
   0xf   :  { %872 = vset.pattern.permute.xlu2 %v1037_v0  ;;  %871 = vset.pattern.permute.xlu1 %v1038_v1  ;;  %v1131_v3 = vld [vmem:[#allocation2] sm:$0xf]  ;;  %62 = vst [vmem:[#allocation1] ss:$2 sm:$0xff] %v1133_v4  ;;  %v1040_v7 = vmov 4   ;;  %v1041_v8 = vmov 3  }
  0x10   :  { %870 = vset.pattern.permute.xlu0 %v1039_v2  ;;  %277 = vperm.xlu2 %872, %v1131_v3   ;;  %vm67_vm0 = vcmask 1043456   ;;  %v102_v10 = vld [vmem:[#allocation7 + $0x8] sm:$0xff]  ;;  %v1042_v51 = vmov 7   ;;  %v1043_v52 = vmov 6   ;;  %vm142_vm1 = vcmask 1040384   ;;  %s1045_s0 = smov 1  }
  0x11   :  { %269 = vperm.xlu1 %871, %v1131_v3   ;;  %263 = vperm.xlu0 %870, %v1131_v3   ;;  %vm145_vm2 = vcmask 1041408   ;;  %vm148_vm3 = vcmask 1042432   ;;  %s1046_s2 = smov 2   ;;  %s1047_s30 = smov 3  }
  0x12   :  { %s1048_s4 = smov 126   ;;  %s1049_s5 = smov 127  }
  0x13   :  { %s1050_s6 = smov 125   ;;  %s1085_s7 = smov 48  }
  0x14   :  { %s1088_s8 = smov 32   ;;  %s1094_s9 = smov 96  }
  0x15   :  { %s1095_s10 = smov 112   ;;  %s1096_s11 = smov 80  }
  0x16   :  { %v63_v5 = vld.sshfl [vmem:[#allocation1] sm:$0xff pattern:$0x75316420]  ;;  %v64_v6 = vld.sshfl [vmem:[#allocation1 + $0x8] sm:$0xff pattern:$0x75316420] }
  0x17   :  { %82 = vst [vmem:[#allocation1] ss:$2 sm:$0xff] %v1133_v4  ;;  %v68_v9 = vsel %vm67_vm0, %v63_v5, 0.0  ;;  %v75_v15 = vsel %vm67_vm0, %v64_v6, 0.0  ;;  %v1044_v6 = vmov 5   ;;  %s1097_s12 = smov [#allocation8]  }
  0x18   :  { %874 = vset.pattern.permute.xlu2 %v1040_v7  ;;  %v69_v11 = vrot.slane %v68_v9, 4  ;;  %v76_v18 = vrot.slane %v75_v15, 4  ;;  %s786_s13 = sshll.u32 %s1097_s12, 4  ;;  %s788_s16 = sshll.u32 %s1473_s3, 4  ;;  %s787_s13 = int_to_ptr.vmem [resolvable:$true] %s786_s13  ;;  %s789_s16 = int_to_ptr.hbm [resolvable:$true] %s788_s16 }
  0x19   :  { %873 = vset.pattern.permute.xlu1 %v1041_v8  ;;  %293 = vperm.xlu2 %874, %v1131_v3  }
  0x1a   :  { %285 = vperm.xlu1 %873, %v1131_v3   ;;  %v70_v16 = vadd.f32 %v69_v11, %v68_v9  ;;  %v77_v25 = vadd.f32 %v76_v18, %v75_v15  ;;  %875 = vset.pattern.permute.xlu0 %v1044_v6  ;;  %v1078_v6 = vmov 37  }
  0x1c   :  { %v71_v20 = vrot.slane %v70_v16, 2  ;;  %v78_v34 = vrot.slane %v77_v25, 2 }
  0x1e   :  { %v83_v12 = vld.sshfl [vmem:[#allocation1] sm:$0xff pattern:$0x75316420]  ;;  %v84_v13 = vld.sshfl [vmem:[#allocation1 + $0x8] sm:$0xff pattern:$0x75316420]  ;;  %v72_v30 = vadd.f32 %v71_v20, %v70_v16  ;;  %v79_v43 = vadd.f32 %v78_v34, %v77_v25 }
  0x1f   :  { %v87_v14 = vsel %vm67_vm0, %v83_v12, -inf  ;;  %104 = vst [vmem:[#allocation1] ss:$2 sm:$0xff] %v102_v10  ;;  %v94_v19 = vsel %vm67_vm0, %v84_v13, -inf  ;;  %v1052_v20 = vmov 9   ;;  %v1057_v25 = vmov 15  }
  0x20   :  { %v88_v17 = vrot.slane %v87_v14, 4  ;;  %v95_v22 = vrot.slane %v94_v19, 4  ;;  %v73_v38 = vrot.slane %v72_v30, 1  ;;  %v80_v60 = vrot.slane %v79_v43, 1 }
  0x21   :  { %877 = vset.pattern.permute.xlu2 %v1042_v51  ;;  %v1065_v34 = vmov 27   ;;  %v1075_v51 = vmov 30  }
  0x22   :  { %v89_v21 = vmax.f32 %v87_v14, %v88_v17  ;;  %v96_v32 = vmax.f32 %v94_v19, %v95_v22  ;;  %876 = vset.pattern.permute.xlu1 %v1043_v52  ;;  %v74_v54 = vadd.f32 %v73_v38, %v72_v30  ;;  %v81_v8 = vadd.f32 %v80_v60, %v79_v43 }
  0x23   :  { %v1051_v19 = vmov 10   ;;  %v1054_v22 = vmov 12   ;;  %v1062_v30 = vmov 22   ;;  %v1068_v38 = vmov 36  }
  0x24   :  { %v90_v31 = vrot.slane %v89_v21, 2  ;;  %v97_v40 = vrot.slane %v96_v32, 2  ;;  %v1071_v43 = vmov 32  }
  0x26   :  { %v105_v23 = vld.sshfl [vmem:[#allocation1] sm:$0xff pattern:$0x75316420]  ;;  %v106_v24 = vld.sshfl [vmem:[#allocation1 + $0x8] sm:$0xff pattern:$0x75316420]  ;;  %v91_v39 = vmax.f32 %v89_v21, %v90_v31  ;;  %v98_v58 = vmax.f32 %v96_v32, %v97_v40 }
  0x27   :  { %v109_v26 = vsel %vm67_vm0, %v105_v23, 0.0  ;;  %123 = vst [vmem:[#allocation1] ss:$2 sm:$0xff] %v102_v10  ;;  %v116_v27 = vsel %vm67_vm0, %v106_v24, 0.0  ;;  %v1053_v21 = vmov 8   ;;  %v1055_v23 = vmov 11  }
  0x28   :  { %v110_v28 = vrot.slane %v109_v26, 4  ;;  %v117_v29 = vrot.slane %v116_v27, 4  ;;  %v92_v53 = vrot.slane %v91_v39, 1  ;;  %v99_v5 = vrot.slane %v98_v58, 1 }
  0x29   :  { %v1056_v24 = vmov 13   ;;  %v1063_v32 = vmov 20   ;;  %v1069_v40 = vmov 24  }
  0x2a   :  { %v111_v33 = vadd.f32 %v110_v28, %v109_v26  ;;  %v118_v35 = vadd.f32 %v117_v29, %v116_v27  ;;  %v93_v63 = vmax.f32 %v91_v39, %v92_v53  ;;  %v100_v13 = vmax.f32 %v98_v58, %v99_v5 }
  0x2b   :  { %v1058_v26 = vmov 14   ;;  %v1059_v27 = vmov 16   ;;  %v1060_v28 = vmov 18   ;;  %v1061_v29 = vmov 17  }
  0x2c   :  { %v112_v36 = vrot.slane %v111_v33, 2  ;;  %v119_v37 = vrot.slane %v118_v35, 2 }
  0x2e   :  { %v113_v41 = vadd.f32 %v112_v36, %v111_v33  ;;  %v124_v42 = vld.sshfl [vmem:[#allocation1] sm:$0xff pattern:$0x75316420]  ;;  %v125_v44 = vld.sshfl [vmem:[#allocation1 + $0x8] sm:$0xff pattern:$0x75316420]  ;;  %v120_v49 = vadd.f32 %v119_v37, %v118_v35 }
  0x2f   :  { %v128_v45 = vsel %vm67_vm0, %v124_v42, -inf  ;;  %v135_v46 = vsel %vm67_vm0, %v125_v44, -inf  ;;  %v1064_v33 = vmov 19   ;;  %v1066_v36 = vmov 21  }
  0x30   :  { %v114_v47 = vrot.slane %v113_v41, 1  ;;  %v129_v48 = vrot.slane %v128_v45, 4  ;;  %v136_v50 = vrot.slane %v135_v46, 4  ;;  %v121_v61 = vrot.slane %v120_v49, 1 }
  0x31   :  { %v1067_v37 = vmov 23  }
  0x32   :  { %v115_v55 = vadd.f32 %v114_v47, %v113_v41  ;;  %v130_v56 = vmax.f32 %v128_v45, %v129_v48  ;;  %v137_v57 = vmax.f32 %v135_v46, %v136_v50  ;;  %v122_v9 = vadd.f32 %v121_v61, %v120_v49 }
  0x33   :  { %v1070_v41 = vmov 25   ;;  %v1072_v45 = vmov 26   ;;  %v1073_v46 = vmov 28   ;;  %v1074_v50 = vmov 29  }
  0x34   :  { %v131_v59 = vrot.slane %v130_v56, 2  ;;  %v138_v62 = vrot.slane %v137_v57, 2  ;;  %v143_v1 = vsel %vm142_vm1, %v74_v54, %v115_v55  ;;  %v144_v15 = vsel %vm142_vm1, %v81_v8, %v122_v9  ;;  %v156_v8 = vld [vmem:[#allocation5 + $0x2] ss:$8 sm:$0x3] }
  0x35   :  { %v146_v10 = vsel %vm145_vm2, %v143_v1, %v93_v63  ;;  %v147_v17 = vsel %vm145_vm2, %v144_v15, %v100_v13  ;;  %v179_v55 = vlaneseq  ;;  %v152_v63 = vld [vmem:[#allocation5] ss:$8 sm:$0x3]  ;;  %v214_v15 = vperm.slane %v156_v8, 1 }
  0x36   :  { %v132_v0 = vmax.f32 %v130_v56, %v131_v59  ;;  %v139_v2 = vmax.f32 %v137_v57, %v138_v62  ;;  %v1076_v56 = vmov 35   ;;  %v1077_v57 = vmov 31   ;;  %v154_v62 = vld [vmem:[#allocation5 + $0x1] ss:$8 sm:$0x3] }
  0x37   :  { %v1220_v60 = vand.u32 127, %v179_v55  ;;  %v186_v1 = vperm.slane %v152_v63, 1 }
  0x38   :  { %v133_v7 = vrot.slane %v132_v0, 1  ;;  %v140_v12 = vrot.slane %v139_v2, 1 }
  0x39   :  { %vm195_vm4 = vcmp.lt.s32.totalorder %v1220_v60, 2  ;;  %vm181_vm5 = vcmp.lt.s32.totalorder %v1220_v60, 3  ;;  %vm209_vm6 = vcmp.lt.s32.totalorder %v1220_v60, 1  ;;  %vm223_vm7 = vcmp.lt.s32.totalorder %v1220_v60, 127 }
  0x3a   :  { %v134_v11 = vmax.f32 %v132_v0, %v133_v7  ;;  %v141_v16 = vmax.f32 %v139_v2, %v140_v12  ;;  %v200_v0 = vperm.slane %v154_v62, 1  ;;  %v1079_v7 = vmov 42  }
  0x3b   :  { %vm237_vm8 = vcmp.lt.s32.totalorder %v1220_v60, 126  ;;  %vm251_vm9 = vcmp.lt.s32.totalorder %v1220_v60, 125  ;;  %vm320_vm10 = vcmp.lt.s32.totalorder %v1220_v60, 48  ;;  %vm390_vm11 = vcmp.lt.s32.totalorder %v1220_v60, 32 }
  0x3c   :  { %v1152_v14 = vsel %vm148_vm3, %v146_v10, %v134_v11  ;;  %v1159_v18 = vsel %vm148_vm3, %v147_v17, %v141_v16  ;;  %v199_v16 = vperm.slane %v154_v62, 0  ;;  %v185_v17 = vperm.slane %v152_v63, 0 }
  0x3d   :  { %205 = vrot.lane.b32.xlu2 %v1152_v14, %s1045_s0  ;;  %191 = vrot.lane.b32.xlu1 %v1152_v14, %s1046_s2  ;;  %vm460_vm12 = vcmp.lt.s32.totalorder %v1220_v60, 16  ;;  %vm586_vm13 = vcmp.lt.s32.totalorder %v1220_v60, 112  ;;  %vm656_vm14 = vcmp.lt.s32.totalorder %v1220_v60, 96  ;;  %vm726_vm15 = vcmp.lt.s32.totalorder %v1220_v60, 80 }
  0x3e   :  { %175 = vrot.lane.b32.xlu0 %v1152_v14, %s1047_s30 }
  0x45   :  { %207 = vrot.lane.b32.xlu2 %v1159_v18, %s1045_s0  ;;  %193 = vrot.lane.b32.xlu1 %v1159_v18, %s1046_s2 }
  0x46   :  { %177 = vrot.lane.b32.xlu0 %v1159_v18, %s1047_s30 }
  0x4d   :  { %233 = vrot.lane.b32.xlu2 %v1152_v14, %s1048_s4  ;;  %221 = vrot.lane.b32.xlu1 %v1159_v18, %s1049_s5 }
  0x4e   :  { %219 = vrot.lane.b32.xlu0 %v1152_v14, %s1049_s5 }
  0x55   :  { %333 = vperm.xlu2 %877, %v1131_v3   ;;  %309 = vperm.xlu1 %876, %v1131_v3  }
  0x56   :  { %235 = vrot.lane.b32.xlu0 %v1159_v18, %s1048_s4 }
  0x5d   :  { %249 = vrot.lane.b32.xlu2 %v1159_v18, %s1050_s6  ;;  %247 = vrot.lane.b32.xlu1 %v1152_v14, %s1050_s6 }
  0x5e   :  { %301 = vperm.xlu0 %875, %v1131_v3   ;;  %880 = vset.pattern.permute.xlu2 %v1051_v19 }
  0x5f   :  { %879 = vset.pattern.permute.xlu1 %v1052_v20  ;;  %v158_v20 = vld [vmem:[#allocation5 + $0x4] ss:$8 sm:$0x3] }
  0x60   :  { %v227_v55 = vperm.slane %v158_v20, 0 }
  0x65   :  { %355 = vperm.xlu2 %880, %v1131_v3   ;;  %347 = vperm.xlu1 %879, %v1131_v3  }
  0x66   :  { %878 = vset.pattern.permute.xlu0 %v1053_v21 }
  0x67   :  { %339 = vperm.xlu0 %878, %v1131_v3  }
  0x6a   :  { %v1185_v31 = vpop.permute.xlu2 %277 }
  0x6d   :  { %882 = vset.pattern.permute.xlu2 %v1054_v22  ;;  %881 = vset.pattern.permute.xlu1 %v1055_v23 }
  0x6e   :  { %371 = vperm.xlu2 %882, %v1131_v3   ;;  %363 = vperm.xlu1 %881, %v1131_v3  }
  0x6f   :  { %883 = vset.pattern.permute.xlu0 %v1056_v24 }
  0x70   :  { %379 = vperm.xlu0 %883, %v1131_v3  }
  0x73   :  { %v1190_v35 = vpop.permute.xlu2 %293 }
  0x76   :  { %885 = vset.pattern.permute.xlu2 %v1057_v25  ;;  %884 = vset.pattern.permute.xlu1 %v1058_v26  ;;  %v228_v26 = vperm.slane %v158_v20, 1 }
  0x77   :  { %409 = vperm.xlu2 %885, %v1131_v3   ;;  %403 = vperm.xlu1 %884, %v1131_v3  }
  0x78   :  { %886 = vset.pattern.permute.xlu0 %v1059_v27 }
  0x79   :  { %417 = vperm.xlu0 %886, %v1131_v3  }
  0x7f   :  { %888 = vset.pattern.permute.xlu2 %v1060_v28  ;;  %887 = vset.pattern.permute.xlu1 %v1061_v29 }
  0x80   :  { %433 = vperm.xlu2 %888, %v1131_v3   ;;  %425 = vperm.xlu1 %887, %v1131_v3  }
  0x81   :  { %892 = vset.pattern.permute.xlu0 %v1062_v30  ;;  %v1080_v30 = vmov 43  }
  0x82   :  { %479 = vperm.xlu0 %892, %v1131_v3  }
  0x83   :  { %v1199_v42 = vpop.permute.xlu1 %269  ;;  %v1208_v48 = vpop.permute.xlu0 %263 }
  0x88   :  { %890 = vset.pattern.permute.xlu2 %v1063_v32  ;;  %889 = vset.pattern.permute.xlu1 %v1064_v33  ;;  %v1081_v32 = vmov 38  }
  0x89   :  { %449 = vperm.xlu2 %890, %v1131_v3   ;;  %441 = vperm.xlu1 %889, %v1131_v3  }
  0x8a   :  { %897 = vset.pattern.permute.xlu0 %v1065_v34  ;;  %v213_v34 = vperm.slane %v156_v8, 0 }
  0x8b   :  { %519 = vperm.xlu0 %897, %v1131_v3  }
  0x8c   :  { %v1206_v47 = vpop.permute.xlu1 %285 }
  0x91   :  { %891 = vset.pattern.permute.xlu2 %v1066_v36  ;;  %893 = vset.pattern.permute.xlu1 %v1067_v37  ;;  %v160_v36 = vld [vmem:[#allocation5 + $0x5] ss:$8 sm:$0x3] }
  0x92   :  { %473 = vperm.xlu2 %891, %v1131_v3   ;;  %487 = vperm.xlu1 %893, %v1131_v3   ;;  %v241_v8 = vperm.slane %v160_v36, 0 }
  0x93   :  { %902 = vset.pattern.permute.xlu0 %v1068_v38 }
  0x94   :  { %605 = vperm.xlu0 %902, %v1131_v3  }
  0x97   :  { %v1195_v39 = vpop.permute.xlu2 %205 }
  0x9a   :  { %894 = vset.pattern.permute.xlu2 %v1069_v40  ;;  %895 = vset.pattern.permute.xlu1 %v1070_v41 }
  0x9b   :  { %495 = vperm.xlu2 %894, %v1131_v3   ;;  %503 = vperm.xlu1 %895, %v1131_v3  }
  0x9c   :  { %907 = vset.pattern.permute.xlu0 %v1071_v43 }
  0x9d   :  { %559 = vperm.xlu0 %907, %v1131_v3  }
  0x9f   :  { %v1202_v44 = vpop.permute.xlu2 %207 }
  0xa0   :  { %v210_v19 = vsel %vm209_vm6, %v1195_v39, %v1202_v44  ;;  %v211_v41 = vsel %vm209_vm6, %v1202_v44, %v1195_v39 }
  0xa1   :  { %v1250_v25 = vmul.f32 %v214_v15, %v210_v19 }
  0xa3   :  { %896 = vset.pattern.permute.xlu2 %v1072_v45  ;;  %898 = vset.pattern.permute.xlu1 %v1073_v46  ;;  %v162_v45 = vld [vmem:[#allocation5 + $0x6] ss:$8 sm:$0x3]  ;;  %v281_v46 = vmul.f32 %v1185_v31, %v1250_v25 }
  0xa4   :  { %511 = vperm.xlu2 %896, %v1131_v3   ;;  %529 = vperm.xlu1 %898, %v1131_v3  }
  0xa7   :  { %v1210_v49 = vpop.permute.xlu2 %233 }
  0xac   :  { %899 = vset.pattern.permute.xlu2 %v1074_v50  ;;  %900 = vset.pattern.permute.xlu1 %v1075_v51  ;;  %v242_v50 = vperm.slane %v160_v36, 1 }
  0xad   :  { %535 = vperm.xlu2 %899, %v1131_v3   ;;  %543 = vperm.xlu1 %900, %v1131_v3  }
  0xaf   :  { %v192_v52 = vpop.permute.xlu1 %191  ;;  %v1214_v53 = vpop.permute.xlu2 %333 }
  0xb0   :  { %v176_v54 = vpop.permute.xlu0 %175 }
  0xb5   :  { %901 = vset.pattern.permute.xlu2 %v1076_v56  ;;  %903 = vset.pattern.permute.xlu1 %v1077_v57  ;;  %v256_v56 = vperm.slane %v162_v45, 1  ;;  %v289_v57 = vmul.f32 %v1206_v47, %v1159_v18 }
  0xb6   :  { %599 = vperm.xlu2 %901, %v1131_v3   ;;  %551 = vperm.xlu1 %903, %v1131_v3  }
  0xb7   :  { %v194_v58 = vpop.permute.xlu1 %193  ;;  %v1218_v59 = vpop.permute.xlu2 %249 }
  0xb8   :  { %v178_v61 = vpop.permute.xlu0 %177  ;;  %v196_v2 = vsel %vm195_vm4, %v192_v52, %v194_v58  ;;  %v197_v21 = vsel %vm195_vm4, %v194_v58, %v192_v52 }
  0xb9   :  { %v182_v5 = vsel %vm181_vm5, %v176_v54, %v178_v61  ;;  %v1233_v11 = vmul.f32 %v200_v0, %v196_v2  ;;  %v183_v22 = vsel %vm181_vm5, %v178_v61, %v176_v54  ;;  %v1252_v27 = vmul.f32 %v199_v16, %v197_v21 }
  0xba   :  { %v1235_v12 = vmul.f32 %v186_v1, %v182_v5  ;;  %v1254_v28 = vmul.f32 %v185_v17, %v183_v22  ;;  %v1277_v54 = vmul.f32 %v213_v34, %v211_v41  ;;  %v1082_v5 = vmov 44  }
  0xbb   :  { %v273_v24 = vmul.f32 %v1199_v42, %v1233_v11  ;;  %v272_v52 = vmul.f32 %v1199_v42, %v1252_v27  ;;  %v255_v17 = vperm.slane %v162_v45, 0 }
  0xbc   :  { %v267_v23 = vmul.f32 %v1208_v48, %v1235_v12  ;;  %v266_v51 = vmul.f32 %v1208_v48, %v1254_v28  ;;  %v280_v0 = vmul.f32 %v1185_v31, %v1277_v54  ;;  %v336_v36 = vmul.f32 %v1214_v53, %v1254_v28 }
  0xbe   :  { %904 = vset.pattern.permute.xlu2 %v1078_v6  ;;  %905 = vset.pattern.permute.xlu1 %v1079_v7  ;;  %v275_v40 = vadd.f32 %v273_v24, %v267_v23  ;;  %v274_v62 = vadd.f32 %v272_v52, %v266_v51  ;;  %v1083_v6 = vmov 33   ;;  %v288_v23 = vmul.f32 %v1206_v47, %v1152_v14 }
  0xbf   :  { %613 = vperm.xlu2 %904, %v1131_v3   ;;  %669 = vperm.xlu1 %905, %v1131_v3   ;;  %v222_v9 = vpop.permute.xlu1 %221  ;;  %v1230_v10 = vpop.permute.xlu2 %355  ;;  %v337_v47 = vmul.f32 %v1214_v53, %v1235_v12  ;;  %v1086_v51 = vmov 34  }
  0xc0   :  { %v220_v13 = vpop.permute.xlu0 %219  ;;  %v283_v44 = vadd.f32 %v281_v46, %v275_v40  ;;  %v282_v19 = vadd.f32 %v280_v0, %v274_v62  ;;  %v1084_v40 = vmov 39  }
  0xc1   :  { %v225_v29 = vsel %vm223_vm7, %v222_v9, %v220_v13  ;;  %v224_v48 = vsel %vm223_vm7, %v220_v13, %v222_v9 }
  0xc2   :  { %v1269_v43 = vmul.f32 %v228_v26, %v225_v29  ;;  %v291_v1 = vadd.f32 %v289_v57, %v283_v44  ;;  %v1296_v7 = vmul.f32 %v227_v55, %v224_v48  ;;  %v290_v29 = vadd.f32 %v288_v23, %v282_v19 }
  0xc3   :  { %v358_v57 = vmul.f32 %v1230_v10, %v1152_v14  ;;  %v359_v48 = vmul.f32 %v1230_v10, %v1159_v18  ;;  %v1087_v10 = vmov 40   ;;  %v1089_v23 = vmov 45  }
  0xc4   :  { %v297_v42 = vmul.f32 %v1190_v35, %v1269_v43  ;;  %912 = vset.pattern.permute.xlu0 %v1089_v23 }
  0xc6   :  { %v299_v16 = vadd.f32 %v297_v42, %v291_v1 }
  0xc7   :  { %906 = vset.pattern.permute.xlu2 %v1080_v30  ;;  %908 = vset.pattern.permute.xlu1 %v1081_v32  ;;  %v1258_v33 = vpop.permute.xlu1 %309 }
  0xc8   :  { %v236_v37 = vpop.permute.xlu0 %235  ;;  %675 = vperm.xlu2 %906, %v1131_v3   ;;  %621 = vperm.xlu1 %908, %v1131_v3   ;;  %v1262_v38 = vpop.permute.xlu2 %371 }
  0xc9   :  { %v239_v39 = vsel %vm237_vm8, %v236_v37, %v1210_v49  ;;  %v238_v31 = vsel %vm237_vm8, %v1210_v49, %v236_v37  ;;  %v296_v49 = vmul.f32 %v1190_v35, %v1296_v7 }
  0xca   :  { %v1289_v58 = vmul.f32 %v242_v50, %v239_v39  ;;  %v1315_v24 = vmul.f32 %v241_v8, %v238_v31 }
  0xcf   :  { %v248_v61 = vpop.permute.xlu1 %247 }
  0xd0   :  { %v253_v63 = vsel %vm251_vm9, %v1218_v59, %v248_v61  ;;  %v302_v2 = vpop.permute.xlu0 %301  ;;  %909 = vset.pattern.permute.xlu2 %v1082_v5  ;;  %910 = vset.pattern.permute.xlu1 %v1083_v6  ;;  %v252_v20 = vsel %vm251_vm9, %v248_v61, %v1218_v59  ;;  %v298_v59 = vadd.f32 %v296_v49, %v290_v29 }
  0xd1   :  { %v1298_v9 = vmul.f32 %v256_v56, %v253_v63  ;;  %v305_v13 = vmul.f32 %v302_v2, %v1289_v58  ;;  %683 = vperm.xlu2 %909, %v1131_v3   ;;  %v1302_v15 = vpop.permute.xlu2 %409  ;;  %567 = vperm.xlu1 %910, %v1131_v3   ;;  %v1319_v26 = vmul.f32 %v255_v17, %v252_v20 }
  0xd2   :  { %v304_v30 = vmul.f32 %v302_v2, %v1315_v24  ;;  %v374_v2 = vmul.f32 %v1262_v38, %v1315_v24  ;;  %v375_v5 = vmul.f32 %v1262_v38, %v1289_v58 }
  0xd3   :  { %v307_v21 = vadd.f32 %v305_v13, %v299_v16  ;;  %v313_v22 = vmul.f32 %v1258_v33, %v1298_v9  ;;  %v312_v50 = vmul.f32 %v1258_v33, %v1319_v26 }
  0xd4   :  { %v306_v46 = vadd.f32 %v304_v30, %v298_v59 }
  0xd5   :  { %v315_v34 = vadd.f32 %v313_v22, %v307_v21 }
  0xd6   :  { %v314_v61 = vadd.f32 %v312_v50, %v306_v46 }
  0xd7   :  { %v348_v32 = vpop.permute.xlu1 %347 }
  0xd8   :  { %v350_v52 = vmul.f32 %v348_v32, %v1277_v54  ;;  %v351_v53 = vmul.f32 %v348_v32, %v1250_v25  ;;  %v412_v32 = vmul.f32 %v1302_v15, %v1252_v27 }
  0xd9   :  { %v340_v37 = vpop.permute.xlu0 %339  ;;  %911 = vset.pattern.permute.xlu2 %v1084_v40  ;;  %318 = vrot.lane.b32.xlu1 %v315_v34, %s1085_s7  ;;  %v413_v34 = vmul.f32 %v1302_v15, %v1233_v11 }
  0xda   :  { %v342_v41 = vmul.f32 %v340_v37, %v1252_v27  ;;  %v343_v35 = vmul.f32 %v340_v37, %v1233_v11  ;;  %629 = vperm.xlu2 %911, %v1131_v3   ;;  %v1329_v45 = vpop.permute.xlu2 %433  ;;  %913 = vset.pattern.permute.xlu1 %v1086_v51 }
  0xdc   :  { %v344_v55 = vadd.f32 %v342_v41, %v336_v36  ;;  %v345_v39 = vadd.f32 %v343_v35, %v337_v47 }
  0xde   :  { %v352_v44 = vadd.f32 %v350_v52, %v344_v55  ;;  %v353_v56 = vadd.f32 %v351_v53, %v345_v39 }
  0xe0   :  { %v364_v42 = vpop.permute.xlu1 %363  ;;  %v360_v62 = vadd.f32 %v358_v57, %v352_v44  ;;  %v361_v33 = vadd.f32 %v359_v48, %v353_v56 }
  0xe1   :  { %v366_v63 = vmul.f32 %v364_v42, %v1296_v7  ;;  %v367_v0 = vmul.f32 %v364_v42, %v1269_v43  ;;  %v1090_v42 = vmov 46  }
  0xe2   :  { %v380_v1 = vpop.permute.xlu0 %379  ;;  %316 = vrot.lane.b32.xlu2 %v314_v61, %s1085_s7  ;;  %v436_v61 = vmul.f32 %v1329_v45, %v1296_v7 }
  0xe3   :  { %v368_v6 = vadd.f32 %v366_v63, %v360_v62  ;;  %v369_v8 = vadd.f32 %v367_v0, %v361_v33  ;;  %v450_v13 = vpop.permute.xlu2 %449  ;;  %914 = vset.pattern.permute.xlu2 %v1087_v10  ;;  %v382_v17 = vmul.f32 %v380_v1, %v1319_v26  ;;  %v383_v19 = vmul.f32 %v380_v1, %v1298_v9 }
  0xe4   :  { %v437_v62 = vmul.f32 %v1329_v45, %v1269_v43  ;;  %v1091_v33 = vmov 41  }
  0xe5   :  { %v376_v31 = vadd.f32 %v374_v2, %v368_v6  ;;  %v377_v16 = vadd.f32 %v375_v5, %v369_v8  ;;  %v452_v6 = vmul.f32 %v450_v13, %v1319_v26  ;;  %v453_v8 = vmul.f32 %v450_v13, %v1298_v9 }
  0xe7   :  { %v384_v20 = vadd.f32 %v382_v17, %v376_v31  ;;  %v385_v21 = vadd.f32 %v383_v19, %v377_v16 }
  0xe9   :  { %v404_v22 = vpop.permute.xlu1 %403  ;;  %386 = vrot.lane.b32.xlu1 %v384_v20, %s1088_s8 }
  0xea   :  { %388 = vrot.lane.b32.xlu2 %v385_v21, %s1088_s8  ;;  %v406_v29 = vmul.f32 %v404_v22, %v1254_v28  ;;  %v407_v30 = vmul.f32 %v404_v22, %v1235_v12 }
  0xeb   :  { %v418_v38 = vpop.permute.xlu0 %417 }
  0xec   :  { %v474_v49 = vpop.permute.xlu2 %473  ;;  %v414_v59 = vadd.f32 %v412_v32, %v406_v29  ;;  %v415_v36 = vadd.f32 %v413_v34, %v407_v30  ;;  %v420_v37 = vmul.f32 %v418_v38, %v1277_v54  ;;  %v421_v40 = vmul.f32 %v418_v38, %v1250_v25 }
  0xed   :  { %v476_v50 = vmul.f32 %v474_v49, %v1254_v28  ;;  %v477_v15 = vmul.f32 %v474_v49, %v1235_v12 }
  0xee   :  { %v422_v55 = vadd.f32 %v420_v37, %v414_v59  ;;  %v423_v39 = vadd.f32 %v421_v40, %v415_v36 }
  0xf1   :  { %575 = vperm.xlu1 %913, %v1131_v3  }
  0xf2   :  { %v426_v47 = vpop.permute.xlu1 %425  ;;  %637 = vperm.xlu2 %914, %v1131_v3  }
  0xf3   :  { %v428_v41 = vmul.f32 %v426_v47, %v1152_v14  ;;  %v429_v35 = vmul.f32 %v426_v47, %v1159_v18 }
  0xf4   :  { %v480_v46 = vpop.permute.xlu0 %479 }
  0xf5   :  { %v482_v51 = vmul.f32 %v480_v46, %v1252_v27  ;;  %v483_v52 = vmul.f32 %v480_v46, %v1233_v11  ;;  %v496_v53 = vpop.permute.xlu2 %495  ;;  %v430_v57 = vadd.f32 %v428_v41, %v422_v55  ;;  %v431_v48 = vadd.f32 %v429_v35, %v423_v39 }
  0xf6   :  { %v498_v20 = vmul.f32 %v496_v53, %v1152_v14  ;;  %v499_v21 = vmul.f32 %v496_v53, %v1159_v18  ;;  %v1093_v53 = vmov 47  }
  0xf7   :  { %v484_v44 = vadd.f32 %v482_v51, %v476_v50  ;;  %v485_v56 = vadd.f32 %v483_v52, %v477_v15  ;;  %v439_v2 = vadd.f32 %v437_v62, %v431_v48  ;;  %v438_v5 = vadd.f32 %v436_v61, %v430_v57 }
  0xf8   :  { %v1092_v52 = vmov 48  }
  0xf9   :  { %915 = vset.pattern.permute.xlu1 %v1090_v42 }
  0xfa   :  { %916 = vset.pattern.permute.xlu2 %v1091_v33 }
  0xfb   :  { %v442_v63 = vpop.permute.xlu1 %441  ;;  %645 = vperm.xlu2 %916, %v1131_v3  }
  0xfc   :  { %v444_v0 = vmul.f32 %v442_v63, %v1315_v24  ;;  %v445_v1 = vmul.f32 %v442_v63, %v1289_v58 }
  0xfd   :  { %v520_v32 = vpop.permute.xlu0 %519 }
  0xfe   :  { %v512_v10 = vpop.permute.xlu2 %511  ;;  %v447_v31 = vadd.f32 %v445_v1, %v439_v2  ;;  %v446_v16 = vadd.f32 %v444_v0, %v438_v5  ;;  %v522_v46 = vmul.f32 %v520_v32, %v1319_v26  ;;  %v523_v50 = vmul.f32 %v520_v32, %v1298_v9 }
  0xff   :  { %v514_v37 = vmul.f32 %v512_v10, %v1315_v24  ;;  %v515_v40 = vmul.f32 %v512_v10, %v1289_v58 }
 0x100   :  { %v455_v17 = vadd.f32 %v453_v8, %v447_v31  ;;  %v454_v45 = vadd.f32 %v452_v6, %v446_v16 }
 0x102   :  { %458 = vrot.lane.b32.xlu1 %v455_v17, %s1032_s21  ;;  %456 = vrot.lane.b32.xlu0 %v454_v45, %s1032_s21 }
 0x104   :  { %v488_v19 = vpop.permute.xlu1 %487 }
 0x105   :  { %v490_v22 = vmul.f32 %v488_v19, %v1277_v54  ;;  %v491_v23 = vmul.f32 %v488_v19, %v1250_v25 }
 0x107   :  { %v492_v38 = vadd.f32 %v490_v22, %v484_v44  ;;  %v493_v13 = vadd.f32 %v491_v23, %v485_v56  ;;  %v1378_v49 = vpop.permute.xlu2 %535  ;;  %v606_v44 = vpop.permute.xlu0 %605 }
 0x108   :  { %v608_v48 = vmul.f32 %v606_v44, %v1252_v27 }
 0x109   :  { %v500_v29 = vadd.f32 %v498_v20, %v492_v38  ;;  %v501_v30 = vadd.f32 %v499_v21, %v493_v13 }
 0x10a   :  { %699 = vperm.xlu1 %915, %v1131_v3   ;;  %691 = vperm.xlu0 %912, %v1131_v3  }
 0x10d   :  { %v504_v34 = vpop.permute.xlu1 %503 }
 0x10e   :  { %v506_v59 = vmul.f32 %v504_v34, %v1296_v7  ;;  %v507_v36 = vmul.f32 %v504_v34, %v1269_v43 }
 0x110   :  { %v508_v47 = vadd.f32 %v506_v59, %v500_v29  ;;  %v509_v41 = vadd.f32 %v507_v36, %v501_v30  ;;  %v600_v35 = vpop.permute.xlu2 %599  ;;  %v609_v30 = vmul.f32 %v606_v44, %v1233_v11 }
 0x111   :  { %v602_v56 = vmul.f32 %v600_v35, %v1254_v28  ;;  %v603_v29 = vmul.f32 %v600_v35, %v1235_v12 }
 0x112   :  { %v516_v15 = vadd.f32 %v514_v37, %v508_v47  ;;  %v517_v51 = vadd.f32 %v515_v40, %v509_v41  ;;  %918 = vset.pattern.permute.xlu1 %v1092_v52  ;;  %917 = vset.pattern.permute.xlu0 %v1093_v53 }
 0x113   :  { %715 = vperm.xlu1 %918, %v1131_v3   ;;  %707 = vperm.xlu0 %917, %v1131_v3   ;;  %v610_v61 = vadd.f32 %v608_v48, %v602_v56  ;;  %v611_v34 = vadd.f32 %v609_v30, %v603_v29 }
 0x114   :  { %v1390_v55 = vadd.f32 %v522_v46, %v516_v15  ;;  %v1392_v39 = vadd.f32 %v523_v50, %v517_v51  ;;  %v164_v51 = vld [vmem:[#allocation5 + $0x7] ss:$8 sm:$0x3] }
 0x116   :  { %v530_v57 = vpop.permute.xlu1 %529 }
 0x117   :  { %v532_v53 = vmul.f32 %v530_v57, %v1254_v28  ;;  %v533_v44 = vmul.f32 %v530_v57, %v1235_v12 }
 0x119   :  { %v614_v42 = vpop.permute.xlu2 %613 }
 0x11a   :  { %v616_v62 = vmul.f32 %v614_v42, %v1277_v54  ;;  %v617_v32 = vmul.f32 %v614_v42, %v1250_v25  ;;  %v166_v42 = vld [vmem:[#allocation5 + $0x10] ss:$8 sm:$0x3] }
 0x11b   :  { %919 = vset.pattern.permute.xlu0 %v1092_v52 }
 0x11c   :  { %v1397_v33 = vadd.f32 %v616_v62, %v610_v61  ;;  %v619_v41 = vadd.f32 %v617_v32, %v611_v34  ;;  %v538_v61 = vmul.f32 %v1378_v49, %v1252_v27  ;;  %v539_v62 = vmul.f32 %v1378_v49, %v1233_v11 }
 0x11e   :  { %v540_v57 = vadd.f32 %v538_v61, %v532_v53 }
 0x11f   :  { %v544_v63 = vpop.permute.xlu1 %543 }
 0x122   :  { %v676_v0 = vpop.permute.xlu2 %675 }
 0x123   :  { %v678_v5 = vmul.f32 %v676_v0, %v1252_v27  ;;  %v679_v6 = vmul.f32 %v676_v0, %v1233_v11  ;;  %v546_v0 = vmul.f32 %v544_v63, %v1277_v54 }
 0x128   :  { %v552_v3 = vpop.permute.xlu1 %551 }
 0x129   :  { %v555_v27 = vmul.f32 %v552_v3, %v1159_v18 }
 0x12b   :  { %v684_v1 = vpop.permute.xlu2 %683 }
 0x12c   :  { %v686_v31 = vmul.f32 %v684_v1, %v1277_v54  ;;  %v687_v16 = vmul.f32 %v684_v1, %v1250_v25  ;;  %v547_v1 = vmul.f32 %v544_v63, %v1250_v25  ;;  %v548_v54 = vadd.f32 %v546_v0, %v540_v57  ;;  %v168_v0 = vld [vmem:[#allocation5 + $0x11] ss:$8 sm:$0x3] }
 0x131   :  { %v670_v2 = vpop.permute.xlu1 %669 }
 0x132   :  { %v672_v8 = vmul.f32 %v670_v2, %v1254_v28  ;;  %v673_v10 = vmul.f32 %v670_v2, %v1235_v12  ;;  %v324_v2 = vperm.slane %v164_v51, 0  ;;  %v394_v12 = vperm.slane %v166_v42, 0 }
 0x133   :  { %v395_v28 = vperm.slane %v166_v42, 1 }
 0x134   :  { %v680_v17 = vadd.f32 %v678_v5, %v672_v8  ;;  %v681_v45 = vadd.f32 %v679_v6, %v673_v10  ;;  %v1405_v19 = vpop.permute.xlu2 %629  ;;  %v325_v6 = vperm.slane %v164_v51, 1  ;;  %v541_v8 = vadd.f32 %v539_v62, %v533_v44 }
 0x135   :  { %v633_v50 = vmul.f32 %v1405_v19, %v1269_v43  ;;  %v554_v10 = vmul.f32 %v552_v3, %v1152_v14 }
 0x136   :  { %v1407_v20 = vadd.f32 %v686_v31, %v680_v17  ;;  %v1409_v21 = vadd.f32 %v687_v16, %v681_v45  ;;  %v549_v49 = vadd.f32 %v547_v1, %v541_v8  ;;  %v560_v31 = vpop.permute.xlu0 %559  ;;  %v465_v1 = vperm.slane %v168_v0, 1 }
 0x137   :  { %v556_v29 = vadd.f32 %v554_v10, %v548_v54  ;;  %v563_v3 = vmul.f32 %v560_v31, %v1269_v43 }
 0x138   :  { %v557_v30 = vadd.f32 %v555_v27, %v549_v49 }
 0x13a   :  { %v622_v22 = vpop.permute.xlu1 %621 }
 0x13b   :  { %v625_v59 = vmul.f32 %v622_v22, %v1159_v18 }
 0x13c   :  { %v317_v23 = vpop.permute.xlu2 %316 }
 0x13d   :  { %v627_v46 = vadd.f32 %v625_v59, %v619_v41  ;;  %v562_v59 = vmul.f32 %v560_v31, %v1296_v7 }
 0x13f   :  { %v635_v15 = vadd.f32 %v633_v50, %v627_v46  ;;  %v624_v46 = vmul.f32 %v622_v22, %v1152_v14  ;;  %v565_v50 = vadd.f32 %v563_v3, %v557_v30 }
 0x141   :  { %v626_v53 = vadd.f32 %v624_v46, %v1397_v33  ;;  %v464_v33 = vperm.slane %v168_v0, 0  ;;  %v174_v46 = vld [vmem:[#allocation5 + $0x15] ss:$8 sm:$0x3] }
 0x143   :  { %v568_v38 = vpop.permute.xlu1 %567 }
 0x144   :  { %v389_v13 = vpop.permute.xlu2 %388  ;;  %v571_v41 = vmul.f32 %v568_v38, %v1289_v58 }
 0x14b   :  { %v319_v36 = vpop.permute.xlu1 %318 }
 0x14c   :  { %v638_v37 = vpop.permute.xlu2 %637  ;;  %v321_v40 = vsel %vm320_vm10, %v317_v23, %v319_v36  ;;  %v322_v47 = vsel %vm320_vm10, %v319_v36, %v317_v23  ;;  %v570_v36 = vmul.f32 %v568_v38, %v1315_v24 }
 0x14d   :  { %v641_v35 = vmul.f32 %v638_v37, %v1289_v58  ;;  %v328_v16 = vmul.f32 %v324_v2, %v322_v47  ;;  %v329_v17 = vmul.f32 %v325_v6, %v321_v40  ;;  %v640_v38 = vmul.f32 %v638_v37, %v1315_v24 }
 0x14f   :  { %v643_v56 = vadd.f32 %v641_v35, %v635_v15  ;;  %v573_v35 = vadd.f32 %v571_v41, %v565_v50 }
 0x155   :  { %v646_v52 = vpop.permute.xlu2 %645 }
 0x156   :  { %v649_v48 = vmul.f32 %v646_v52, %v1298_v9  ;;  %v648_v42 = vmul.f32 %v646_v52, %v1319_v26 }
 0x158   :  { %v651_v5 = vadd.f32 %v649_v48, %v643_v56  ;;  %v632_v48 = vmul.f32 %v1405_v19, %v1296_v7 }
 0x15a   :  { %654 = vrot.lane.b32.xlu0 %v651_v5, %s1094_s9  ;;  %v634_v22 = vadd.f32 %v632_v48, %v626_v53  ;;  %v731_v53 = vperm.slane %v174_v46, 1 }
 0x15b   :  { %v387_v11 = vpop.permute.xlu1 %386 }
 0x15c   :  { %v391_v25 = vsel %vm390_vm11, %v387_v11, %v389_v13  ;;  %v392_v63 = vsel %vm390_vm11, %v389_v13, %v387_v11  ;;  %v564_v13 = vadd.f32 %v562_v59, %v556_v29  ;;  %v642_v61 = vadd.f32 %v640_v38, %v634_v22 }
 0x15d   :  { %v398_v45 = vmul.f32 %v394_v12, %v392_v63  ;;  %v399_v23 = vmul.f32 %v395_v28, %v391_v25 }
 0x15e   :  { %v572_v40 = vadd.f32 %v570_v36, %v564_v13  ;;  %v650_v62 = vadd.f32 %v648_v42, %v642_v61 }
 0x15f   :  { %v400_v32 = vadd.f32 %v398_v45, %v328_v16  ;;  %v401_v34 = vadd.f32 %v399_v23, %v329_v17 }
 0x163   :  { %v576_v47 = vpop.permute.xlu1 %575 }
 0x164   :  { %v578_v15 = vmul.f32 %v576_v47, %v1319_v26  ;;  %v579_v51 = vmul.f32 %v576_v47, %v1298_v9 }
 0x166   :  { %v580_v44 = vadd.f32 %v578_v15, %v572_v40  ;;  %v581_v56 = vadd.f32 %v579_v51, %v573_v35  ;;  %v730_v51 = vperm.slane %v174_v46, 0 }
 0x168   :  { %584 = vrot.lane.b32.xlu1 %v581_v56, %s1095_s10  ;;  %582 = vrot.lane.b32.xlu2 %v580_v44, %s1095_s10 }
 0x170   :  { %652 = vrot.lane.b32.xlu2 %v650_v62, %s1094_s9 }
 0x174   :  { %v459_v2 = vpop.permute.xlu1 %458  ;;  %v457_v5 = vpop.permute.xlu0 %456 }
 0x175   :  { %v461_v19 = vsel %vm460_vm12, %v457_v5, %v459_v2  ;;  %v462_v6 = vsel %vm460_vm12, %v459_v2, %v457_v5 }
 0x176   :  { %v468_v37 = vmul.f32 %v464_v33, %v462_v6  ;;  %v469_v12 = vmul.f32 %v465_v1, %v461_v19 }
 0x178   :  { %v470_v28 = vadd.f32 %v468_v37, %v400_v32  ;;  %v471_v57 = vadd.f32 %v469_v12, %v401_v34 }
 0x17a   :  { %v526_v8 = vadd.f32 %v1390_v55, %v470_v28  ;;  %v527_v52 = vadd.f32 %v1392_v39, %v471_v57 }
 0x17c   :  { %v700_v10 = vpop.permute.xlu1 %699  ;;  %v692_v27 = vpop.permute.xlu0 %691 }
 0x17d   :  { %v694_v11 = vmul.f32 %v692_v27, %v1152_v14  ;;  %v695_v54 = vmul.f32 %v692_v27, %v1159_v18  ;;  %v702_v63 = vmul.f32 %v700_v10, %v1296_v7  ;;  %v703_v31 = vmul.f32 %v700_v10, %v1269_v43  ;;  %v170_v7 = vld [vmem:[#allocation5 + $0x13] ss:$8 sm:$0x3] }
 0x17e   :  { %v590_v34 = vperm.slane %v170_v7, 0 }
 0x17f   :  { %v696_v49 = vadd.f32 %v694_v11, %v1407_v20  ;;  %v697_v25 = vadd.f32 %v695_v54, %v1409_v21 }
 0x181   :  { %v704_v45 = vadd.f32 %v702_v63, %v696_v49  ;;  %v705_v55 = vadd.f32 %v703_v31, %v697_v25 }
 0x185   :  { %v716_v16 = vpop.permute.xlu1 %715  ;;  %v708_v17 = vpop.permute.xlu0 %707 }
 0x186   :  { %v710_v39 = vmul.f32 %v708_v17, %v1315_v24  ;;  %v711_v23 = vmul.f32 %v708_v17, %v1289_v58  ;;  %v718_v14 = vmul.f32 %v716_v16, %v1319_v26  ;;  %v719_v18 = vmul.f32 %v716_v16, %v1298_v9  ;;  %v172_v26 = vld [vmem:[#allocation5 + $0x14] ss:$8 sm:$0x3] }
 0x187   :  { %v591_v24 = vperm.slane %v170_v7, 1  ;;  %v660_v13 = vperm.slane %v172_v26, 0  ;;  %v661_v50 = vperm.slane %v172_v26, 1 }
 0x188   :  { %v712_v29 = vadd.f32 %v710_v39, %v704_v45  ;;  %v713_v20 = vadd.f32 %v711_v23, %v705_v55 }
 0x18a   :  { %v720_v30 = vadd.f32 %v718_v14, %v712_v29  ;;  %v721_v21 = vadd.f32 %v719_v18, %v713_v20  ;;  %v771_v14 = vld [vmem:[#allocation7 + $0x8] sm:$0xff] }
 0x18c   :  { %722 = vrot.lane.b32.xlu1 %v720_v30, %s1096_s11  ;;  %724 = vrot.lane.b32.xlu2 %v721_v21, %s1096_s11 }
 0x1c2   :  { %v583_v43 = vpop.permute.xlu2 %582 }
 0x1ca   :  { %v653_v3 = vpop.permute.xlu2 %652 }
 0x1cc   :  { %v655_v9 = vpop.permute.xlu0 %654 }
 0x1cd   :  { %v657_v47 = vsel %vm656_vm14, %v653_v3, %v655_v9  ;;  %v658_v40 = vsel %vm656_vm14, %v655_v9, %v653_v3 }
 0x1ce   :  { %v664_v44 = vmul.f32 %v660_v13, %v657_v47  ;;  %v665_v56 = vmul.f32 %v661_v50, %v658_v40 }
 0x1da   :  { %v585_v32 = vpop.permute.xlu1 %584 }
 0x1db   :  { %v587_v59 = vsel %vm586_vm13, %v583_v43, %v585_v32  ;;  %v588_v58 = vsel %vm586_vm13, %v585_v32, %v583_v43 }
 0x1dc   :  { %v594_v36 = vmul.f32 %v590_v34, %v587_v59  ;;  %v595_v41 = vmul.f32 %v591_v24, %v588_v58 }
 0x1de   :  { %v596_v35 = vadd.f32 %v594_v36, %v526_v8  ;;  %v597_v15 = vadd.f32 %v595_v41, %v527_v52 }
 0x1e0   :  { %v666_v61 = vadd.f32 %v664_v44, %v596_v35  ;;  %v667_v62 = vadd.f32 %v665_v56, %v597_v15 }
 0x1e6   :  { %v725_v48 = vpop.permute.xlu2 %724 }
 0x1fe   :  { %v723_v38 = vpop.permute.xlu1 %722 }
 0x1ff   :  { %v727_v22 = vsel %vm726_vm15, %v723_v38, %v725_v48  ;;  %v728_v42 = vsel %vm726_vm15, %v725_v48, %v723_v38 }
 0x200   :  { %v734_v0 = vmul.f32 %v730_v51, %v727_v22  ;;  %v735_v33 = vmul.f32 %v731_v53, %v728_v42 }
 0x202   :  { %v736_v1 = vadd.f32 %v734_v0, %v666_v61  ;;  %v737_v2 = vadd.f32 %v735_v33, %v667_v62 }
 0x204   :  { %v740_v5 = vrot.slane %v736_v1, 2  ;;  %v741_v19 = vrot.slane %v737_v2, 2 }
 0x206   :  { %v744_v6 = vadd.f32 %v740_v5, %v736_v1  ;;  %v745_v60 = vadd.f32 %v741_v19, %v737_v2 }
 0x208   :  { %v746_v37 = vsub.f32 0.0, %v744_v6  ;;  %v747_v12 = vsub.f32 0.0, %v745_v60 }
 0x20a   :  { %v748_v28 = vmul.f32 1.442695, %v746_v37  ;;  %v750_v57 = vmul.f32 1.442695, %v747_v12 }
 0x20c   :  { %920 = vpow2.f32 %v748_v28 }
 0x20d   :  { %922 = vpow2.f32 %v750_v57 }
 0x212   :  { %v921_v8 = vpop.eup %920 }
 0x213   :  { %v923_v52 = vpop.eup %922  ;;  %v752_v10 = vadd.f32 1.0, %v921_v8 }
 0x214   :  { %v753_v27 = vadd.f32 1.0, %v923_v52 }
 0x215   :  { %924 = vrcp.f32 %v752_v10 }
 0x216   :  { %926 = vrcp.f32 %v753_v27 }
 0x21b   :  { %v925_v11 = vpop.eup %924 }
 0x21c   :  { %v927_v54 = vpop.eup %926  ;;  %v756_v49 = vmul.f32 %v925_v11, %v752_v10 }
 0x21d   :  { %v757_v25 = vmul.f32 %v927_v54, %v753_v27 }
 0x21e   :  { %v758_v63 = vsub.f32 2.0, %v756_v49 }
 0x21f   :  { %v759_v31 = vsub.f32 2.0, %v757_v25 }
 0x220   :  { %v760_v16 = vmul.f32 %v925_v11, %v758_v63 }
 0x221   :  { %v761_v17 = vmul.f32 %v927_v54, %v759_v31 }
 0x222   :  { %v762_v39 = vperm.slane %v760_v16, 0  ;;  %v772_v18 = vperm.slane %v760_v16, 1 }
 0x223   :  { %v763_v45 = vperm.slane %v761_v17, 0  ;;  %v773_v55 = vperm.slane %v761_v17, 1 }
 0x225   :  { %v766_v23 = vrot.slane %v763_v45, 4  ;;  %v776_v29 = vrot.slane %v773_v55, 4 }
 0x227   :  { %v767_v20 = vsel %vm67_vm0, %v762_v39, %v766_v23  ;;  %v777_v30 = vsel %vm67_vm0, %v772_v18, %v776_v29 }
 0x228   :  { %v769_v21 = vmul.f32 %v767_v20, %v1133_v4  ;;  %v779_v43 = vmul.f32 %v777_v30, %v771_v14 }
 0x22a   :  { %770 = vst [vmem:[#allocation8] sm:$0xff] %v769_v21 }
 0x22b   :  { %781 = vst [vmem:[#allocation8 + $0x8] sm:$0xff] %v779_v43 }
 0x22c   :  { %794 = dma.vmem_to_hbm [thread:$0]  %s787_s13, 256, %s789_s16, [#allocation4], %s1035_s28, %s1035_s28, %s1036_s29  }
 0x22d   :  { %1028 = dma.done.wait [#allocation4], 256  }
 0x22e   :  { %1029 = vsyncadd [#allocation4], 4294967040 }
 0x22f   :  { %799 = vsyncpa [#allocation3], 1 }
 0x230   :  { %800 = vsyncpa [#allocation6], 1 }
 0x231   :  { %801 = vsyncpa [#allocation4], 1 }

</bundles_post_ra>
